<compile_context>
chip_gen: v7x
topology: tpu7x:2x2x1
jax: 0.10.0
libtpu: 0.0.40
codegen_flags: <defaults>
</compile_context>

<pallas_src>
import functools

import jax
import jax.numpy as jnp
from jax.experimental import pallas as pl
from jax.experimental.pallas import tpu as pltpu

_MAX_TB = 512      # largest batch tile (lane axis), multiple of 128
_HID_PAD = 128     # hidden widths padded up to a multiple of this

# dot_general dims for W[out, in] @ x[batch, in]^T  ->  [out, batch]
_TRANS_B = (((1,), (1,)), ((), ()))


def _round_up(x, m):
    return ((x + m - 1) // m) * m


def _pick_batch_tile(batch):
    """Largest tile <= 512 that keeps >=2 grid steps when batch allows it
    (v7x megacore shards the 'parallel' batch axis across both TensorCores)."""
    bp = _round_up(batch, 128)
    if bp <= 128:
        return 128
    return min(_MAX_TB, max(128, _round_up(bp // 2, 128)))


# ----------------------------- Pallas kernel --------------------------------


def _renorm_rows_max1(x):
    """nn.Embedding(max_norm=1) on batch-major rows: rows with L2 norm > 1 are
    rescaled to norm 1. rsqrt(max(ss,1)) == where(ss>1, rsqrt(ss), 1) but never
    touches rsqrt(0). Runs in f32; result cast back to bf16 (MXU operand)."""
    xf = x.astype(jnp.float32)
    ss = jnp.sum(xf * xf, axis=1, keepdims=True)            # [TB, 1]
    scale = jax.lax.rsqrt(jnp.maximum(ss, 1.0))             # EUP slot
    return (xf * scale).astype(jnp.bfloat16)                # [TB, dim]


def _tower_T(x, w1, b1, w2, b2, w3, b3):
    """3-layer MLP. x is batch-major [TB, dim]; layer 1 folds the transpose
    into an rhs-transposed MXU matmul so everything downstream is
    feature-major [hidden, TB] (batch on the 128-lane axis). bf16 operands,
    f32 accumulation / bias / ReLU."""
    h = jax.lax.dot_general(w1, x, _TRANS_B,
                            preferred_element_type=jnp.float32) + b1
    h = jnp.maximum(h, 0.0)
    h = jnp.dot(w2, h.astype(w2.dtype), preferred_element_type=jnp.float32) + b2
    h = jnp.maximum(h, 0.0)
    return jnp.dot(w3, h.astype(w3.dtype), preferred_element_type=jnp.float32) + b3


def dssm_kernel(
    u_ref, v_ref,
    uw1_ref, ub1_ref, uw2_ref, ub2_ref, uw3_ref, ub3_ref,
    vw1_ref, vb1_ref, vw2_ref, vb2_ref, vw3_ref, vb3_ref,
    out_ref, *, d4,
):
    u = _renorm_rows_max1(u_ref[...])                        # [TB, dim] bf16
    v = _renorm_rows_max1(v_ref[...])

    uo = _tower_T(u, uw1_ref[...], ub1_ref[...], uw2_ref[...], ub2_ref[...],
                  uw3_ref[...], ub3_ref[...])                # [d4p, TB] f32
    vo = _tower_T(v, vw1_ref[...], vb1_ref[...], vw2_ref[...], vb2_ref[...],
                  vw3_ref[...], vb3_ref[...])

    # Only the first d4 rows are real (rest is zero padding): one vreg group.
    uv = jnp.sum(uo[:d4] * vo[:d4], axis=0, keepdims=True)   # [1, TB]
    out_ref[...] = jax.nn.sigmoid(uv)                        # lane-dense store


# ------------------------------ wrapper --------------------------------------


@jax.jit
def dssm_forward(u_idx, v_idx, params):
    """logit = sigmoid(sum(user_tower(E_u[u]) * item_tower(E_i[v]), axis=-1))."""
    user_emb = params["user_emb"]
    item_emb = params["item_emb"]
    dim = user_emb.shape[1]
    d4 = dim // 4
    batch = u_idx.shape[0]

    tb = _pick_batch_tile(batch)
    n_tiles = pl.cdiv(batch, tb)
    bp = n_tiles * tb

    # Pad the tiny index vectors (not the gathered [B, dim] activations) and
    # feed the kernel batch-major bf16 blocks: no wrapper-side pad/transpose
    # HBM passes over the activations.
    if bp != batch:
        u_idx = jnp.pad(u_idx, (0, bp - batch))
        v_idx = jnp.pad(v_idx, (0, bp - batch))
    u_e = user_emb[u_idx]                                    # [Bp, dim] bf16
    v_e = item_emb[v_idx]

    weights = (
        params["uw1"], params["ub1"], params["uw2"], params["ub2"],
        params["uw3"], params["ub3"],
        params["vw1"], params["vb1"], params["vw2"], params["vb2"],
        params["vw3"], params["vb3"],
    )

    emb_spec = pl.BlockSpec((tb, dim), lambda i: (i, 0))
    # Constant block index -> weights stay resident in VMEM across grid steps.
    resident_specs = [pl.BlockSpec(w.shape, lambda i: (0, 0)) for w in weights]

    out = pl.pallas_call(
        functools.partial(dssm_kernel, d4=d4),
        out_shape=jax.ShapeDtypeStruct((1, bp), jnp.float32),
        grid_spec=pltpu.PrefetchScalarGridSpec(
            num_scalar_prefetch=0,
            grid=(n_tiles,),
            in_specs=[emb_spec, emb_spec] + resident_specs,
            out_specs=pl.BlockSpec((1, tb), lambda i: (0, i)),
        ),
        compiler_params=pltpu.CompilerParams(
            dimension_semantics=("parallel",)),
    )(u_e, v_e, *weights)

    return out[0, :batch]                                    # [B]


# --------------------------- parameter creation ------------------------------


def init_params(key, n_users, n_items, dim):
    d2, d3, d4 = dim // 2, dim // 3, dim // 4
    d2p, d3p, d4p = (_round_up(d, _HID_PAD) for d in (d2, d3, d4))
    keys = jax.random.split(key, 14)

    def lin(kw, kb, fan_in, fan_out, in_p, out_p):
        # PyTorch default Linear init U(-1/sqrt(fan_in), 1/sqrt(fan_in)),
        # stored feature-major [out, in], zero-padded, weights in bf16.
        bound = 1.0 / float(fan_in) ** 0.5
        w = jax.random.uniform(kw, (fan_out, fan_in), jnp.float32, -bound, bound)
        b = jax.random.uniform(kb, (fan_out,), jnp.float32, -bound, bound)
        wp = jnp.zeros((out_p, in_p), jnp.float32).at[:fan_out, :fan_in].set(w)
        bp = jnp.zeros((out_p, 1), jnp.float32).at[:fan_out, 0].set(b)
        return wp.astype(jnp.bfloat16), bp

    params = {
        # bf16 tables: halves gather + kernel-input DMA bytes.
        "user_emb": jax.random.normal(keys[0], (n_users, dim),
                                      jnp.float32).astype(jnp.bfloat16),
        "item_emb": jax.random.normal(keys[1], (n_items, dim),
                                      jnp.float32).astype(jnp.bfloat16),
    }
    params["uw1"], params["ub1"] = lin(keys[2], keys[3], dim, d2, dim, d2p)
    params["uw2"], params["ub2"] = lin(keys[4], keys[5], d2, d3, d2p, d3p)
    params["uw3"], params["ub3"] = lin(keys[6], keys[7], d3, d4, d3p, d4p)
    params["vw1"], params["vb1"] = lin(keys[8], keys[9], dim, d2, dim, d2p)
    params["vw2"], params["vb2"] = lin(keys[10], keys[11], d2, d3, d2p, d3p)
    params["vw3"], params["vb3"] = lin(keys[12], keys[13], d3, d4, d3p, d4p)
    return params


# ------------------------------- reference -----------------------------------


def dssm_reference(u_idx, v_idx, params):
    """Pure-JAX reference mirroring the PyTorch module (same bf16 tables and
    weights, PyTorch-style max_norm renorm with its 1e-7 epsilon)."""
    def renorm(x):
        x = x.astype(jnp.float32)
        n = jnp.sqrt(jnp.sum(x * x, axis=1, keepdims=True))
        return x * jnp.where(n > 1.0, 1.0 / (n + 1e-7), 1.0)

    def tower(x, p):
        h = x
        for i in (1, 2, 3):
            w = params[f"{p}w{i}"]            # bf16 [out_p, in_p]
            b = params[f"{p}b{i}"][:, 0]      # f32  [out_p]
            h = jnp.dot(h.astype(jnp.bfloat16), w.T,
                        preferred_element_type=jnp.float32) + b
            if i < 3:
                h = jax.nn.relu(h)
        return h

    u = tower(renorm(params["user_emb"][u_idx]), "u")
    v = tower(renorm(params["item_emb"][v_idx]), "v")
    return jax.nn.sigmoid(jnp.sum(u * v, axis=1))


# --------------------------------- main ---------------------------------------


if __name__ == "__main__":
    N_USERS, N_ITEMS, DIM, BATCH = 64, 96, 32, 256

    key = jax.random.PRNGKey(0)
    k_params, k_u, k_v = jax.random.split(key, 3)
    params = init_params(k_params, N_USERS, N_ITEMS, DIM)

    u_idx = jax.random.randint(k_u, (BATCH,), 0, N_USERS, dtype=jnp.int32)
    v_idx = jax.random.randint(k_v, (BATCH,), 0, N_ITEMS, dtype=jnp.int32)

    logits = dssm_forward(u_idx, v_idx, params)
    jax.block_until_ready(logits)

    ref = dssm_reference(u_idx, v_idx, params)
    assert logits.shape == (BATCH,)
    max_err = float(jnp.max(jnp.abs(logits - ref)))
    assert jnp.allclose(logits, ref, atol=2e-3, rtol=2e-3), (max_err, logits[:4], ref[:4])

    print("KERNEL_OK")
</pallas_src>

<mosaic_0001>
module attributes {stable_mosaic.version = 11 : i64} {
  func.func @dssm_kernel(%arg0: i32, %arg1: memref<128x32xbf16, #tpu.memory_space<vmem>>, %arg2: memref<128x32xbf16, #tpu.memory_space<vmem>>, %arg3: memref<128x32xbf16, #tpu.memory_space<vmem>>, %arg4: memref<128x1xf32, #tpu.memory_space<vmem>>, %arg5: memref<128x128xbf16, #tpu.memory_space<vmem>>, %arg6: memref<128x1xf32, #tpu.memory_space<vmem>>, %arg7: memref<128x128xbf16, #tpu.memory_space<vmem>>, %arg8: memref<128x1xf32, #tpu.memory_space<vmem>>, %arg9: memref<128x32xbf16, #tpu.memory_space<vmem>>, %arg10: memref<128x1xf32, #tpu.memory_space<vmem>>, %arg11: memref<128x128xbf16, #tpu.memory_space<vmem>>, %arg12: memref<128x1xf32, #tpu.memory_space<vmem>>, %arg13: memref<128x128xbf16, #tpu.memory_space<vmem>>, %arg14: memref<128x1xf32, #tpu.memory_space<vmem>>, %arg15: memref<1x128xf32, #tpu.memory_space<vmem>>) attributes {dimension_semantics = [#tpu.dimension_semantics<parallel>], iteration_bounds = array<i64: 2>, scalar_prefetch = 0 : i64, scratch_operands = 0 : i64, tpu.core_type = #tpu.core_type<tc>, window_params = [{transform_indices = @transform_0, window_bounds = array<i64: 128, 32>}, {transform_indices = @transform_1, window_bounds = array<i64: 128, 32>}, {pipeline_mode = #tpu.pipeline_mode<synchronous>, transform_indices = @transform_2, window_bounds = array<i64: 128, 32>}, {pipeline_mode = #tpu.pipeline_mode<synchronous>, transform_indices = @transform_3, window_bounds = array<i64: 128, 1>}, {pipeline_mode = #tpu.pipeline_mode<synchronous>, transform_indices = @transform_4, window_bounds = array<i64: 128, 128>}, {pipeline_mode = #tpu.pipeline_mode<synchronous>, transform_indices = @transform_5, window_bounds = array<i64: 128, 1>}, {pipeline_mode = #tpu.pipeline_mode<synchronous>, transform_indices = @transform_6, window_bounds = array<i64: 128, 128>}, {pipeline_mode = #tpu.pipeline_mode<synchronous>, transform_indices = @transform_7, window_bounds = array<i64: 128, 1>}, {pipeline_mode = #tpu.pipeline_mode<synchronous>, transform_indices = @transform_8, window_bounds = array<i64: 128, 32>}, {pipeline_mode = #tpu.pipeline_mode<synchronous>, transform_indices = @transform_9, window_bounds = array<i64: 128, 1>}, {pipeline_mode = #tpu.pipeline_mode<synchronous>, transform_indices = @transform_10, window_bounds = array<i64: 128, 128>}, {pipeline_mode = #tpu.pipeline_mode<synchronous>, transform_indices = @transform_11, window_bounds = array<i64: 128, 1>}, {pipeline_mode = #tpu.pipeline_mode<synchronous>, transform_indices = @transform_12, window_bounds = array<i64: 128, 128>}, {pipeline_mode = #tpu.pipeline_mode<synchronous>, transform_indices = @transform_13, window_bounds = array<i64: 128, 1>}, {transform_indices = @transform_14, window_bounds = array<i64: 1, 128>}]} {
    %c0 = arith.constant 0 : index
    %c0_0 = arith.constant 0 : index
    %0 = vector.load %arg1[%c0, %c0_0] : memref<128x32xbf16, #tpu.memory_space<vmem>>, vector<128x32xbf16>
    %1 = arith.extf %0 : vector<128x32xbf16> to vector<128x32xf32>
    %2 = arith.mulf %1, %1 : vector<128x32xf32>
    %cst = arith.constant dense<0.000000e+00> : vector<128xf32>
    %3 = vector.multi_reduction <add>, %2, %cst [1] : vector<128x32xf32> to vector<128xf32>
    %4 = vector.shape_cast %3 : vector<128xf32> to vector<128x1xf32>
    %cst_1 = arith.constant 1.000000e+00 : f32
    %5 = vector.broadcast %cst_1 : f32 to vector<128x1xf32>
    %6 = arith.maximumf %4, %5 : vector<128x1xf32>
    %7 = math.rsqrt %6 : vector<128x1xf32>
    %8 = vector.broadcast %7 : vector<128x1xf32> to vector<128x32xf32>
    %9 = arith.mulf %1, %8 : vector<128x32xf32>
    %10 = arith.truncf %9 : vector<128x32xf32> to vector<128x32xbf16>
    %c0_2 = arith.constant 0 : index
    %c0_3 = arith.constant 0 : index
    %11 = vector.load %arg2[%c0_2, %c0_3] : memref<128x32xbf16, #tpu.memory_space<vmem>>, vector<128x32xbf16>
    %12 = arith.extf %11 : vector<128x32xbf16> to vector<128x32xf32>
    %13 = arith.mulf %12, %12 : vector<128x32xf32>
    %cst_4 = arith.constant dense<0.000000e+00> : vector<128xf32>
    %14 = vector.multi_reduction <add>, %13, %cst_4 [1] : vector<128x32xf32> to vector<128xf32>
    %15 = vector.shape_cast %14 : vector<128xf32> to vector<128x1xf32>
    %cst_5 = arith.constant 1.000000e+00 : f32
    %16 = vector.broadcast %cst_5 : f32 to vector<128x1xf32>
    %17 = arith.maximumf %15, %16 : vector<128x1xf32>
    %18 = math.rsqrt %17 : vector<128x1xf32>
    %19 = vector.broadcast %18 : vector<128x1xf32> to vector<128x32xf32>
    %20 = arith.mulf %12, %19 : vector<128x32xf32>
    %21 = arith.truncf %20 : vector<128x32xf32> to vector<128x32xbf16>
    %c0_6 = arith.constant 0 : index
    %c0_7 = arith.constant 0 : index
    %22 = vector.load %arg3[%c0_6, %c0_7] : memref<128x32xbf16, #tpu.memory_space<vmem>>, vector<128x32xbf16>
    %c0_8 = arith.constant 0 : index
    %c0_9 = arith.constant 0 : index
    %23 = vector.load %arg4[%c0_8, %c0_9] : memref<128x1xf32, #tpu.memory_space<vmem>>, vector<128x1xf32>
    %c0_10 = arith.constant 0 : index
    %c0_11 = arith.constant 0 : index
    %24 = vector.load %arg5[%c0_10, %c0_11] : memref<128x128xbf16, #tpu.memory_space<vmem>>, vector<128x128xbf16>
    %c0_12 = arith.constant 0 : index
    %c0_13 = arith.constant 0 : index
    %25 = vector.load %arg6[%c0_12, %c0_13] : memref<128x1xf32, #tpu.memory_space<vmem>>, vector<128x1xf32>
    %c0_14 = arith.constant 0 : index
    %c0_15 = arith.constant 0 : index
    %26 = vector.load %arg7[%c0_14, %c0_15] : memref<128x128xbf16, #tpu.memory_space<vmem>>, vector<128x128xbf16>
    %c0_16 = arith.constant 0 : index
    %c0_17 = arith.constant 0 : index
    %27 = vector.load %arg8[%c0_16, %c0_17] : memref<128x1xf32, #tpu.memory_space<vmem>>, vector<128x1xf32>
    %cst_18 = arith.constant dense<0.000000e+00> : vector<128x128xf32>
    %28 = tpu.matmul %22, %10, %cst_18 {dimension_numbers = #tpu.dot_dimension_numbers<[1], [1], [0], [0], [0, 0, 1, 0], [], []>} : vector<128x32xbf16>, vector<128x32xbf16>, vector<128x128xf32> -> vector<128x128xf32>
    %29 = vector.broadcast %23 : vector<128x1xf32> to vector<128x128xf32>
    %30 = arith.addf %28, %29 : vector<128x128xf32>
    %cst_19 = arith.constant 0.000000e+00 : f32
    %31 = vector.broadcast %cst_19 : f32 to vector<128x128xf32>
    %32 = arith.maximumf %30, %31 : vector<128x128xf32>
    %33 = arith.truncf %32 : vector<128x128xf32> to vector<128x128xbf16>
    %cst_20 = arith.constant dense<0.000000e+00> : vector<128x128xf32>
    %34 = tpu.matmul %24, %33, %cst_20 {dimension_numbers = #tpu.dot_dimension_numbers<[1], [0], [0], [1], [0, 0, 1, 1], [], []>} : vector<128x128xbf16>, vector<128x128xbf16>, vector<128x128xf32> -> vector<128x128xf32>
    %35 = vector.broadcast %25 : vector<128x1xf32> to vector<128x128xf32>
    %36 = arith.addf %34, %35 : vector<128x128xf32>
    %cst_21 = arith.constant 0.000000e+00 : f32
    %37 = vector.broadcast %cst_21 : f32 to vector<128x128xf32>
    %38 = arith.maximumf %36, %37 : vector<128x128xf32>
    %39 = arith.truncf %38 : vector<128x128xf32> to vector<128x128xbf16>
    %cst_22 = arith.constant dense<0.000000e+00> : vector<128x128xf32>
    %40 = tpu.matmul %26, %39, %cst_22 {dimension_numbers = #tpu.dot_dimension_numbers<[1], [0], [0], [1], [0, 0, 1, 1], [], []>} : vector<128x128xbf16>, vector<128x128xbf16>, vector<128x128xf32> -> vector<128x128xf32>
    %41 = vector.broadcast %27 : vector<128x1xf32> to vector<128x128xf32>
    %42 = arith.addf %40, %41 : vector<128x128xf32>
    %c0_23 = arith.constant 0 : index
    %c0_24 = arith.constant 0 : index
    %43 = vector.load %arg9[%c0_23, %c0_24] : memref<128x32xbf16, #tpu.memory_space<vmem>>, vector<128x32xbf16>
    %c0_25 = arith.constant 0 : index
    %c0_26 = arith.constant 0 : index
    %44 = vector.load %arg10[%c0_25, %c0_26] : memref<128x1xf32, #tpu.memory_space<vmem>>, vector<128x1xf32>
    %c0_27 = arith.constant 0 : index
    %c0_28 = arith.constant 0 : index
    %45 = vector.load %arg11[%c0_27, %c0_28] : memref<128x128xbf16, #tpu.memory_space<vmem>>, vector<128x128xbf16>
    %c0_29 = arith.constant 0 : index
    %c0_30 = arith.constant 0 : index
    %46 = vector.load %arg12[%c0_29, %c0_30] : memref<128x1xf32, #tpu.memory_space<vmem>>, vector<128x1xf32>
    %c0_31 = arith.constant 0 : index
    %c0_32 = arith.constant 0 : index
    %47 = vector.load %arg13[%c0_31, %c0_32] : memref<128x128xbf16, #tpu.memory_space<vmem>>, vector<128x128xbf16>
    %c0_33 = arith.constant 0 : index
    %c0_34 = arith.constant 0 : index
    %48 = vector.load %arg14[%c0_33, %c0_34] : memref<128x1xf32, #tpu.memory_space<vmem>>, vector<128x1xf32>
    %cst_35 = arith.constant dense<0.000000e+00> : vector<128x128xf32>
    %49 = tpu.matmul %43, %21, %cst_35 {dimension_numbers = #tpu.dot_dimension_numbers<[1], [1], [0], [0], [0, 0, 1, 0], [], []>} : vector<128x32xbf16>, vector<128x32xbf16>, vector<128x128xf32> -> vector<128x128xf32>
    %50 = vector.broadcast %44 : vector<128x1xf32> to vector<128x128xf32>
    %51 = arith.addf %49, %50 : vector<128x128xf32>
    %cst_36 = arith.constant 0.000000e+00 : f32
    %52 = vector.broadcast %cst_36 : f32 to vector<128x128xf32>
    %53 = arith.maximumf %51, %52 : vector<128x128xf32>
    %54 = arith.truncf %53 : vector<128x128xf32> to vector<128x128xbf16>
    %cst_37 = arith.constant dense<0.000000e+00> : vector<128x128xf32>
    %55 = tpu.matmul %45, %54, %cst_37 {dimension_numbers = #tpu.dot_dimension_numbers<[1], [0], [0], [1], [0, 0, 1, 1], [], []>} : vector<128x128xbf16>, vector<128x128xbf16>, vector<128x128xf32> -> vector<128x128xf32>
    %56 = vector.broadcast %46 : vector<128x1xf32> to vector<128x128xf32>
    %57 = arith.addf %55, %56 : vector<128x128xf32>
    %cst_38 = arith.constant 0.000000e+00 : f32
    %58 = vector.broadcast %cst_38 : f32 to vector<128x128xf32>
    %59 = arith.maximumf %57, %58 : vector<128x128xf32>
    %60 = arith.truncf %59 : vector<128x128xf32> to vector<128x128xbf16>
    %cst_39 = arith.constant dense<0.000000e+00> : vector<128x128xf32>
    %61 = tpu.matmul %47, %60, %cst_39 {dimension_numbers = #tpu.dot_dimension_numbers<[1], [0], [0], [1], [0, 0, 1, 1], [], []>} : vector<128x128xbf16>, vector<128x128xbf16>, vector<128x128xf32> -> vector<128x128xf32>
    %62 = vector.broadcast %48 : vector<128x1xf32> to vector<128x128xf32>
    %63 = arith.addf %61, %62 : vector<128x128xf32>
    %64 = vector.extract_strided_slice %42 {offsets = [0, 0], sizes = [8, 128], strides = [1, 1]} : vector<128x128xf32> to vector<8x128xf32>
    %65 = vector.extract_strided_slice %63 {offsets = [0, 0], sizes = [8, 128], strides = [1, 1]} : vector<128x128xf32> to vector<8x128xf32>
    %66 = arith.mulf %64, %65 : vector<8x128xf32>
    %cst_40 = arith.constant dense<0.000000e+00> : vector<128xf32>
    %67 = vector.multi_reduction <add>, %66, %cst_40 [0] : vector<8x128xf32> to vector<128xf32>
    %68 = vector.shape_cast %67 : vector<128xf32> to vector<1x128xf32>
    %69 = arith.negf %68 : vector<1x128xf32>
    %70 = math.exp %69 : vector<1x128xf32>
    %cst_41 = arith.constant 1.000000e+00 : f32
    %71 = vector.broadcast %cst_41 : f32 to vector<1x128xf32>
    %72 = arith.addf %71, %70 : vector<1x128xf32>
    %73 = arith.divf %71, %72 : vector<1x128xf32>
    %c0_42 = arith.constant 0 : index
    %c0_43 = arith.constant 0 : index
    %74 = vector.load %arg15[%c0_42, %c0_43] : memref<1x128xf32, #tpu.memory_space<vmem>>, vector<1x128xf32>
    tpu.vector_store %arg15[%c0_42, %c0_43], %73 {strides = array<i32>} : memref<1x128xf32, #tpu.memory_space<vmem>>, vector<1x128xf32>,
    return
  }
  func.func @transform_0(%arg0: i32) -> (i32, i32) {
    %c0_i32 = arith.constant 0 : i32
    %c0_i32_0 = arith.constant 0 : i32
    return %arg0, %c0_i32 : i32, i32
  }
  func.func @transform_1(%arg0: i32) -> (i32, i32) {
    %c0_i32 = arith.constant 0 : i32
    %c0_i32_0 = arith.constant 0 : i32
    return %arg0, %c0_i32 : i32, i32
  }
  func.func @transform_2(%arg0: i32) -> (i32, i32) {
    %c0_i32 = arith.constant 0 : i32
    %c0_i32_0 = arith.constant 0 : i32
    %c0_i32_1 = arith.constant 0 : i32
    return %c0_i32, %c0_i32_0 : i32, i32
  }
  func.func @transform_3(%arg0: i32) -> (i32, i32) {
    %c0_i32 = arith.constant 0 : i32
    %c0_i32_0 = arith.constant 0 : i32
    %c0_i32_1 = arith.constant 0 : i32
    return %c0_i32, %c0_i32_0 : i32, i32
  }
  func.func @transform_4(%arg0: i32) -> (i32, i32) {
    %c0_i32 = arith.constant 0 : i32
    %c0_i32_0 = arith.constant 0 : i32
    %c0_i32_1 = arith.constant 0 : i32
    return %c0_i32, %c0_i32_0 : i32, i32
  }
  func.func @transform_5(%arg0: i32) -> (i32, i32) {
    %c0_i32 = arith.constant 0 : i32
    %c0_i32_0 = arith.constant 0 : i32
    %c0_i32_1 = arith.constant 0 : i32
    return %c0_i32, %c0_i32_0 : i32, i32
  }
  func.func @transform_6(%arg0: i32) -> (i32, i32) {
    %c0_i32 = arith.constant 0 : i32
    %c0_i32_0 = arith.constant 0 : i32
    %c0_i32_1 = arith.constant 0 : i32
    return %c0_i32, %c0_i32_0 : i32, i32
  }
  func.func @transform_7(%arg0: i32) -> (i32, i32) {
    %c0_i32 = arith.constant 0 : i32
    %c0_i32_0 = arith.constant 0 : i32
    %c0_i32_1 = arith.constant 0 : i32
    return %c0_i32, %c0_i32_0 : i32, i32
  }
  func.func @transform_8(%arg0: i32) -> (i32, i32) {
    %c0_i32 = arith.constant 0 : i32
    %c0_i32_0 = arith.constant 0 : i32
    %c0_i32_1 = arith.constant 0 : i32
    return %c0_i32, %c0_i32_0 : i32, i32
  }
  func.func @transform_9(%arg0: i32) -> (i32, i32) {
    %c0_i32 = arith.constant 0 : i32
    %c0_i32_0 = arith.constant 0 : i32
    %c0_i32_1 = arith.constant 0 : i32
    return %c0_i32, %c0_i32_0 : i32, i32
  }
  func.func @transform_10(%arg0: i32) -> (i32, i32) {
    %c0_i32 = arith.constant 0 : i32
    %c0_i32_0 = arith.constant 0 : i32
    %c0_i32_1 = arith.constant 0 : i32
    return %c0_i32, %c0_i32_0 : i32, i32
  }
  func.func @transform_11(%arg0: i32) -> (i32, i32) {
    %c0_i32 = arith.constant 0 : i32
    %c0_i32_0 = arith.constant 0 : i32
    %c0_i32_1 = arith.constant 0 : i32
    return %c0_i32, %c0_i32_0 : i32, i32
  }
  func.func @transform_12(%arg0: i32) -> (i32, i32) {
    %c0_i32 = arith.constant 0 : i32
    %c0_i32_0 = arith.constant 0 : i32
    %c0_i32_1 = arith.constant 0 : i32
    return %c0_i32, %c0_i32_0 : i32, i32
  }
  func.func @transform_13(%arg0: i32) -> (i32, i32) {
    %c0_i32 = arith.constant 0 : i32
    %c0_i32_0 = arith.constant 0 : i32
    %c0_i32_1 = arith.constant 0 : i32
    return %c0_i32, %c0_i32_0 : i32, i32
  }
  func.func @transform_14(%arg0: i32) -> (i32, i32) {
    %c0_i32 = arith.constant 0 : i32
    %c0_i32_0 = arith.constant 0 : i32
    return %c0_i32, %arg0 : i32, i32
  }
}

</mosaic_0001>

<bundles_post_ra>
// kernel: dssm_forward.1
= control target key start
LH: loop header
LB: loop body
LE: loop exit
PB: predicated region body
PF: predicated region fallthrough
CT: control target
= control target key end

     0   :  { %s4152_s0 = inlined_call_operand.vmem [shape: bf16[256,32], index: 0, kind: input, shape index: {}]   ;;  %s4153_s1 = inlined_call_operand.vmem [shape: bf16[256,32], index: 1, kind: input, shape index: {}]   ;;  %s4154_s2 = inlined_call_operand.vmem [shape: bf16[128,32], index: 2, kind: input, shape index: {}]   ;;  %s4155_s3 = inlined_call_operand.vmem [shape: f32[128,1], index: 3, kind: input, shape index: {}]   ;;  %s4156_s4 = inlined_call_operand.vmem [shape: bf16[128,128], index: 4, kind: input, shape index: {}]   ;;  %s4157_s5 = inlined_call_operand.vmem [shape: f32[128,1], index: 5, kind: input, shape index: {}]   ;;  %s4158_s6 = inlined_call_operand.vmem [shape: bf16[128,128], index: 6, kind: input, shape index: {}]   ;;  %s4159_s7 = inlined_call_operand.vmem [shape: f32[128,1], index: 7, kind: input, shape index: {}]   ;;  %s4160_s8 = inlined_call_operand.vmem [shape: bf16[128,32], index: 8, kind: input, shape index: {}]   ;;  %s4161_s9 = inlined_call_operand.vmem [shape: f32[128,1], index: 9, kind: input, shape index: {}]   ;;  %s4162_s10 = inlined_call_operand.vmem [shape: bf16[128,128], index: 10, kind: input, shape index: {}]   ;;  %s4163_s11 = inlined_call_operand.vmem [shape: f32[128,1], index: 11, kind: input, shape index: {}]   ;;  %s4164_s12 = inlined_call_operand.vmem [shape: bf16[128,128], index: 12, kind: input, shape index: {}]   ;;  %s4165_s13 = inlined_call_operand.vmem [shape: f32[128,1], index: 13, kind: input, shape index: {}]   ;;  %s4166_s14 = inlined_call_operand.hbm [shape: f32[1,256], index: 14, kind: output, shape index: {}]  }
   0x1   :  { %4168 = sst [smem:[#allocation7_spill]] %s4152_s0 }
   0x2   :  { %4169 = sst [smem:[#allocation8_spill]] %s4153_s1 }
   0x3   :  { %19 = vsyncpa [#allocation3], 0 }
   0x4   :  { %21 = vsyncpa [#allocation3 + $0x1], 0  ;;  %s3304_s29 = smov 0   ;;  %s3306_s30 = smov 0  }
   0x5   :  { %s3308_s15 = smov 0   ;;  %s3310_s16 = smov 0  }
   0x6 LB: > { %4170 = sst [smem:[#allocation5_spill]] %s3221_s15  ;;  %s2546_s17 = sadd.s32 4294967295, %s3225_s16   ;;  %s3225_s16 = sphi %s3310_s16, %s4180_s16   ;;  %s3221_s15 = sphi %s3308_s15, %s4177_s15   ;;  %s3217_s30 = sphi %s3306_s30, %s4179_s30   ;;  %s3213_s29 = sphi %s3304_s29, %s4178_s29  }
   0x7   : > { %s2547_s18 = sadd.s32 4294967294, %s3225_s16   ;;  %s3327_s19 = sadd.s32 1, %s3225_s16  }
   0x8   : > { %s338_s20 = sadd.s32 1, %s3221_s15  ;;  %s335_s21 = ssub.s32 %s3225_s16, %s3327_s19 }
   0x9   : > { %p348_p0 = scmp.ne.s32.totalorder %s3221_s15, %s3217_s30  ;;  %p336_p1 = scmp.eq.s32.totalorder %s335_s21, 0 }
   0xa   : > { %p349_p2 = scmp.eq.s32.totalorder %s2546_s17, 1  ;;  %p354_p3 = scmp.ne.s32.totalorder %s3217_s30, %s3213_s29 }
   0xb   : > { %p355_p4 = scmp.eq.s32.totalorder %s2547_s18, 1  ;;  %p2550_p7 = scmp.ge.s32.totalorder %s3225_s16, 1 }
   0xc   : > { %s3337_s22 = scalar_select %p336_p1, %s3221_s15, %s338_s20  }
   0xd   : > { %p3339_p5 = por %p349_p2, %p348_p0  ;;  %p3343_p6 = por %p355_p4, %p354_p3 }
   0xe   : > { %4171 = sst [smem:[#allocation6_spill]] %s3337_s22  ;;  %p427_p8 = scmp.lt.s32.totalorder %s3225_s16, 3 }
  0x10   : > { %p428_p9 = pnand %p2550_p7, %p427_p8 }
  0x11   : > { %s3349_s25 = sshll.u32 (!%p428_p9), %s2546_s17, 4  ;;  %v3227_v0 = vmov (!%p428_p9), 0   ;;  %s4174_s0 = sld [smem:[#allocation7_spill]] (!%p428_p9)  ;;  %vm538_vm0 = vcmask (!%p428_p9), 261120  }
  0x12   : > { %431 = sbr.rel (%p428_p9) target bundleno = 1322 (0x52a), region = 76  ;;  %p478_p10 = scmp.lt.s32.totalorder (!%p428_p9), %s3349_s25, 31  ;;  %3045 = vset.pattern.permute.xlu1 (!%p428_p9), %v3227_v0  ;;  %3046 = vset.pattern.permute.xlu0 (!%p428_p9), %v3227_v0 }
  0x13   : > { %s4175_s1 = sld [smem:[#allocation8_spill]] (!%p428_p9)  ;;  %s4110_s17 = scalar_lea.hbm (!%p428_p9), %s4166_s14, %s3349_s25 }
  0x19   : > { %s3353_s26 = scalar_select %p478_p10, %s3349_s25, 31 }
  0x1b   : > { %s2552_s27 = sshll.u32 %s3353_s26, 2  ;;  %s475_s26 = sand.u32 1, %s3217_s30  }
  0x1c   : > { %s3361_s20 = scalar_lea.vmem %s4174_s0, %s2552_s27  ;;  %s3406_s28 = scalar_lea.vmem %s4175_s1, %s2552_s27 }
  0x1d   : > { %v2687_v1 = vld [vmem:[%s3361_s20 + $0x8] sm:$0xff]   ;;  %v2624_v2 = vld [vmem:[%s3361_s20] sm:$0xff]   ;;  %v2688_v3 = vld [vmem:[%s3361_s20 + $0x10] sm:$0xff]   ;;  %s476_s27 = scalar_lea.vmem [#allocation2], %s475_s26  ;;  %s2468_s21 = scalar_lea.sflag [#allocation3], %s475_s26 }
  0x1e   : > { %v3366_v4 = vunpack.c.l.bf16 %v2687_v1  ;;  %v3368_v5 = vunpack.c.l.bf16 %v2624_v2  ;;  %v3370_v6 = vunpack.c.h.bf16 %v2687_v1  ;;  %v3372_v7 = vunpack.c.h.bf16 %v2624_v2  ;;  %v2689_v13 = vld [vmem:[%s3361_s20 + $0x18] sm:$0xff]   ;;  %v2690_v19 = vld [vmem:[%s3361_s20 + $0x20] sm:$0xff]   ;;  %v2691_v23 = vld [vmem:[%s3361_s20 + $0x28] sm:$0xff]   ;;  %s2480_s18 = sshll.u32 %s476_s27, 4  ;;  %s3228_s1 = smov [#allocation2]   ;;  %s4112_s18 = int_to_ptr.vmem [resolvable:$true] %s2480_s18 }
  0x1f   : > { %v3374_v8 = vunpack.c.h.bf16 %v2688_v3  ;;  %v3389_v18 = vunpack.c.h.bf16 %v2689_v13  ;;  %v3394_v21 = vunpack.c.l.bf16 %v2688_v3  ;;  %v3396_v22 = vunpack.c.l.bf16 %v2689_v13  ;;  %v2692_v30 = vld [vmem:[%s3361_s20 + $0x30] sm:$0xff]   ;;  %v2693_v31 = vld [vmem:[%s3361_s20 + $0x38] sm:$0xff]   ;;  %v2656_v33 = vld [vmem:[%s3406_s28] sm:$0xff]   ;;  %s3163_s0 = scalar_lea.vmem %s4112_s18, 16  ;;  %s3167_s15 = sshll.u32 %s3228_s1, 4  ;;  %s3168_s15 = int_to_ptr.vmem [resolvable:$false] %s3167_s15 }
  0x20   : > { %v524_v9 = vmul.f32 %v3366_v4, %v3366_v4  ;;  %v522_v10 = vmul.f32 %v3368_v5, %v3368_v5  ;;  %v525_v11 = vmul.f32 %v3370_v6, %v3370_v6  ;;  %v523_v12 = vmul.f32 %v3372_v7, %v3372_v7  ;;  %v2694_v34 = vld [vmem:[%s3406_s28 + $0x8] sm:$0xff]   ;;  %v2696_v13 = vld [vmem:[%s3406_s28 + $0x18] sm:$0xff]   ;;  %p3164_p11 = scmp.ne.s32.totalorder %s4112_s18, %s3163_s0  ;;  %s3169_s22 = scalar_lea.vmem %s3168_s15, 32 }
  0x21   : > { %v527_v20 = vmul.f32 %v3374_v8, %v3374_v8  ;;  %v526_v24 = vmul.f32 %v3394_v21, %v3394_v21  ;;  %v529_v25 = vmul.f32 %v3389_v18, %v3389_v18  ;;  %v3410_v26 = vunpack.c.h.bf16 %v2690_v19  ;;  %p3170_p0 = scmp.lt.s32.totalorder %s4112_s18, %s3168_s15  ;;  %p3171_p1 = scmp.lt.s32.totalorder %s3169_s22, %s3163_s0 }
  0x22   : > { %v545_v14 = vsel %vm538_vm0, %v524_v9, 0.0  ;;  %v539_v15 = vsel %vm538_vm0, %v522_v10, 0.0  ;;  %v548_v16 = vsel %vm538_vm0, %v525_v11, 0.0  ;;  %v542_v17 = vsel %vm538_vm0, %v523_v12, 0.0  ;;  %v2695_v10 = vld [vmem:[%s3406_s28 + $0x10] sm:$0xff]   ;;  %p3165_p12 = pnand %p3164_p11, %p3339_p5 }
  0x23   : > { %546 = vadd.xlane.f32.xlu1 %v545_v14  ;;  %540 = vadd.xlane.f32.xlu0 %v539_v15  ;;  %v3412_v27 = vunpack.c.l.bf16 %v2690_v19  ;;  %v554_v28 = vsel %vm538_vm0, %v527_v20, 0.0  ;;  %v551_v29 = vsel %vm538_vm0, %v526_v24, 0.0  ;;  %v528_v32 = vmul.f32 %v3396_v22, %v3396_v22  ;;  %p3172_p2 = por %p3171_p1, %p3170_p0 }
  0x24   : > { %v560_v35 = vsel %vm538_vm0, %v529_v25, 0.0  ;;  %v531_v36 = vmul.f32 %v3410_v26, %v3410_v26  ;;  %v3425_v37 = vunpack.c.h.bf16 %v2691_v23  ;;  %v3429_v39 = vunpack.c.h.bf16 %v2692_v30  ;;  %p3166_p13 = pneg %p3165_p12 }
  0x25   : > { %v530_v38 = vmul.f32 %v3412_v27, %v3412_v27  ;;  %v3431_v40 = vunpack.c.h.bf16 %v2693_v31  ;;  %v557_v41 = vsel %vm538_vm0, %v528_v32, 0.0  ;;  %v3434_v42 = vunpack.c.l.bf16 %v2691_v23 }
  0x26   : > { %v3436_v43 = vunpack.c.h.bf16 %v2656_v33  ;;  %v3438_v44 = vunpack.c.h.bf16 %v2694_v34  ;;  %v566_v45 = vsel %vm538_vm0, %v531_v36, 0.0  ;;  %v3442_v47 = vunpack.c.l.bf16 %v2692_v30  ;;  %p3173_p3 = pnand %p3172_p2, %p3166_p13 }
  0x27   : > { %549 = vadd.xlane.f32.xlu1 %v548_v16  ;;  %543 = vadd.xlane.f32.xlu0 %v542_v17  ;;  %v563_v46 = vsel %vm538_vm0, %v530_v38, 0.0  ;;  %v3444_v48 = vunpack.c.l.bf16 %v2693_v31  ;;  %v533_v49 = vmul.f32 %v3425_v37, %v3425_v37  ;;  %v535_v50 = vmul.f32 %v3429_v39, %v3429_v39  ;;  %v2697_v16 = vld [vmem:[%s3406_s28 + $0x20] sm:$0xff]  }
  0x28   : > { %v537_v51 = vmul.f32 %v3431_v40, %v3431_v40  ;;  %v532_v52 = vmul.f32 %v3434_v42, %v3434_v42  ;;  %v676_v53 = vmul.f32 %v3436_v43, %v3436_v43  ;;  %v678_v54 = vmul.f32 %v3438_v44, %v3438_v44 }
  0x29   : > { %v534_v55 = vmul.f32 %v3442_v47, %v3442_v47  ;;  %v536_v56 = vmul.f32 %v3444_v48, %v3444_v48  ;;  %v3462_v57 = vunpack.c.l.bf16 %v2656_v33  ;;  %v3464_v58 = vunpack.c.l.bf16 %v2694_v34 }
  0x2a   : > { %v572_v59 = vsel %vm538_vm0, %v533_v49, 0.0  ;;  %v578_v60 = vsel %vm538_vm0, %v535_v50, 0.0  ;;  %v584_v61 = vsel %vm538_vm0, %v537_v51, 0.0  ;;  %v569_v62 = vsel %vm538_vm0, %v532_v52, 0.0 }
  0x2b   : > { %555 = vadd.xlane.f32.xlu1 %v554_v28  ;;  %552 = vadd.xlane.f32.xlu0 %v551_v29  ;;  %v694_v63 = vsel %vm538_vm0, %v676_v53, 0.0  ;;  %v700_v0 = vsel %vm538_vm0, %v678_v54, 0.0  ;;  %v575_v1 = vsel %vm538_vm0, %v534_v55, 0.0  ;;  %v581_v2 = vsel %vm538_vm0, %v536_v56, 0.0  ;;  %v2698_v29 = vld [vmem:[%s3406_s28 + $0x28] sm:$0xff]   ;;  %v813_v54 = vld [vmem:[%s4155_s3 + $0x10] sm:$0xff] }
  0x2c   : > { %v675_v3 = vmul.f32 %v3462_v57, %v3462_v57  ;;  %v677_v9 = vmul.f32 %v3464_v58, %v3464_v58  ;;  %v3482_v14 = vunpack.c.h.bf16 %v2695_v10  ;;  %v3484_v15 = vunpack.c.l.bf16 %v2695_v10  ;;  %v812_v53 = vld [vmem:[%s4155_s3 + $0x8] sm:$0xff]  ;;  %v811_v55 = vld [vmem:[%s4155_s3] sm:$0xff]  ;;  %v814_v56 = vld [vmem:[%s4155_s3 + $0x18] sm:$0xff] }
  0x2d   : > { %v3487_v17 = vunpack.c.l.bf16 %v2696_v13  ;;  %v3493_v23 = vunpack.c.h.bf16 %v2696_v13  ;;  %v3497_v25 = vunpack.c.l.bf16 %v2697_v16  ;;  %v3504_v32 = vunpack.c.h.bf16 %v2697_v16  ;;  %v822_v10 = vld [vmem:[%s4155_s3 + $0x58] sm:$0xff]  ;;  %v2699_v13 = vld [vmem:[%s3406_s28 + $0x30] sm:$0xff]  }
  0x2e   : > { %v691_v11 = vsel %vm538_vm0, %v675_v3, 0.0  ;;  %v697_v12 = vsel %vm538_vm0, %v677_v9, 0.0  ;;  %v680_v19 = vmul.f32 %v3482_v14, %v3482_v14  ;;  %v679_v20 = vmul.f32 %v3484_v15, %v3484_v15  ;;  %v821_v3 = vld [vmem:[%s4155_s3 + $0x50] sm:$0xff]  ;;  %v3047_v9 = vld [vmem:[%s4154_s2] sm:$0xff]  }
  0x2f   : > { %561 = vadd.xlane.f32.xlu1 %v560_v35  ;;  %558 = vadd.xlane.f32.xlu0 %v557_v41  ;;  %v681_v24 = vmul.f32 %v3487_v17, %v3487_v17  ;;  %v682_v31 = vmul.f32 %v3493_v23, %v3493_v23  ;;  %v3507_v34 = vunpack.c.l.bf16 %v2698_v29  ;;  %v683_v35 = vmul.f32 %v3497_v25, %v3497_v25 }
  0x30   : > { %v706_v28 = vsel %vm538_vm0, %v680_v19, 0.0  ;;  %v703_v30 = vsel %vm538_vm0, %v679_v20, 0.0  ;;  %v684_v38 = vmul.f32 %v3504_v32, %v3504_v32  ;;  %v3514_v41 = vunpack.c.h.bf16 %v2698_v29  ;;  %2813 = vmatprep.mubr.msk.bf16.mxu0 %vm538_vm0, %v3047_v9  ;;  %v2700_v19 = vld [vmem:[%s3406_s28 + $0x38] sm:$0xff]  }
  0x31   : > { %v709_v33 = vsel %vm538_vm0, %v681_v24, 0.0  ;;  %v712_v36 = vsel %vm538_vm0, %v682_v31, 0.0  ;;  %v3577_v16 = vunpack.c.h.bf16 %v2699_v13  ;;  %v3582_v24 = vunpack.c.l.bf16 %v2700_v19 }
  0x32   : > { %v718_v49 = vsel %vm538_vm0, %v684_v38, 0.0  ;;  %v686_v50 = vmul.f32 %v3514_v41, %v3514_v41  ;;  %v3588_v31 = vunpack.c.l.bf16 %v2699_v13 }
  0x33   : > { %567 = vadd.xlane.f32.xlu1 %v566_v45  ;;  %564 = vadd.xlane.f32.xlu0 %v563_v46  ;;  %v715_v45 = vsel %vm538_vm0, %v683_v35, 0.0  ;;  %v685_v46 = vmul.f32 %v3507_v34, %v3507_v34  ;;  %v688_v20 = vmul.f32 %v3577_v16, %v3577_v16  ;;  %v689_v29 = vmul.f32 %v3582_v24, %v3582_v24 }
  0x34   : > { %v724_v52 = vsel %vm538_vm0, %v686_v50, 0.0  ;;  %v3592_v35 = vunpack.c.h.bf16 %v2700_v19 }
  0x35   : > { %v721_v51 = vsel %vm538_vm0, %v685_v46, 0.0 }
  0x36   : > { %v690_v50 = vmul.f32 %v3592_v35, %v3592_v35 }
  0x37   : > { %573 = vadd.xlane.f32.xlu1 %v572_v59  ;;  %570 = vadd.xlane.f32.xlu0 %v569_v62  ;;  %v816_v59 = vld [vmem:[%s4155_s3 + $0x28] sm:$0xff]  ;;  %v817_v62 = vld [vmem:[%s4155_s3 + $0x30] sm:$0xff] }
  0x3b   : > { %579 = vadd.xlane.f32.xlu1 %v578_v60  ;;  %576 = vadd.xlane.f32.xlu0 %v575_v1  ;;  %v815_v60 = vld [vmem:[%s4155_s3 + $0x20] sm:$0xff]  ;;  %v826_v1 = vld [vmem:[%s4155_s3 + $0x78] sm:$0xff] }
  0x3f   : > { %585 = vadd.xlane.f32.xlu1 %v584_v61  ;;  %582 = vadd.xlane.f32.xlu0 %v581_v2  ;;  %v820_v61 = vld [vmem:[%s4155_s3 + $0x48] sm:$0xff]  ;;  %v819_v2 = vld [vmem:[%s4155_s3 + $0x40] sm:$0xff] }
  0x43   : > { %695 = vadd.xlane.f32.xlu1 %v694_v63  ;;  %692 = vadd.xlane.f32.xlu0 %v691_v11  ;;  %v823_v63 = vld [vmem:[%s4155_s3 + $0x60] sm:$0xff]  ;;  %v824_v11 = vld [vmem:[%s4155_s3 + $0x68] sm:$0xff] }
  0x47   : > { %701 = vadd.xlane.f32.xlu1 %v700_v0  ;;  %698 = vadd.xlane.f32.xlu0 %v697_v12  ;;  %v818_v0 = vld [vmem:[%s4155_s3 + $0x38] sm:$0xff]  ;;  %v825_v12 = vld [vmem:[%s4155_s3 + $0x70] sm:$0xff] }
  0x4b   : > { %707 = vadd.xlane.f32.xlu1 %v706_v28  ;;  %704 = vadd.xlane.f32.xlu0 %v703_v30  ;;  %v730_v28 = vsel %vm538_vm0, %v688_v20, 0.0  ;;  %v733_v30 = vsel %vm538_vm0, %v689_v29, 0.0 }
  0x4f   : > { %710 = vadd.xlane.f32.xlu1 %v709_v33  ;;  %713 = vadd.xlane.f32.xlu0 %v712_v36  ;;  %v687_v33 = vmul.f32 %v3588_v31, %v3588_v31 }
  0x51   : > { %v727_v46 = vsel %vm538_vm0, %v687_v33, 0.0 }
  0x53   : > { %716 = vadd.xlane.f32.xlu1 %v715_v45  ;;  %719 = vadd.xlane.f32.xlu0 %v718_v49 }
  0x57   : > { %722 = vadd.xlane.f32.xlu1 %v721_v51  ;;  %725 = vadd.xlane.f32.xlu0 %v724_v52  ;;  %v843_v51 = vld [vmem:[%s4157_s5] sm:$0xff] }
  0x68   : > { %898 = vperm.xlu1 %3045, %v812_v53  }
  0x6c   : > { %903 = vperm.xlu1 %3045, %v813_v54  }
  0x6d   : > { %893 = vperm.xlu0 %3046, %v811_v55   ;;  %v736_v55 = vsel %vm538_vm0, %v690_v50, 0.0 }
  0x70   : > { %908 = vperm.xlu1 %3045, %v814_v56  }
  0x71   : > { %918 = vperm.xlu0 %3046, %v816_v59   ;;  %v846_v59 = vld [vmem:[%s4157_s5 + $0x18] sm:$0xff] }
  0x74   : > { %913 = vperm.xlu1 %3045, %v815_v60  }
  0x75   : > { %938 = vperm.xlu0 %3046, %v820_v61  }
  0x78   : > { %923 = vperm.xlu1 %3045, %v817_v62  }
  0x79   : > { %953 = vperm.xlu0 %3046, %v823_v63  }
  0x7c   : > { %928 = vperm.xlu1 %3045, %v818_v0   ;;  %v848_v0 = vld [vmem:[%s4157_s5 + $0x28] sm:$0xff] }
  0x7d   : > { %968 = vperm.xlu0 %3046, %v826_v1  }
  0x80   : > { %933 = vperm.xlu1 %3045, %v819_v2  }
  0x84   : > { %943 = vperm.xlu1 %3045, %v821_v3  }
  0x88   : > { %948 = vperm.xlu1 %3045, %v822_v10  }
  0x8c   : > { %958 = vperm.xlu1 %3045, %v824_v11  }
  0x90   : > { %963 = vperm.xlu1 %3045, %v825_v12   ;;  %v850_v12 = vld [vmem:[%s4157_s5 + $0x38] sm:$0xff] }
  0x9c   : > { %731 = vadd.xlane.f32.xlu0 %v730_v28 }
  0xa0   : > { %734 = vadd.xlane.f32.xlu0 %v733_v30 }
  0xb0   : > { %v541_v36 = vpop.xlane.xlu0 %540  ;;  %v547_v38 = vpop.xlane.xlu1 %546 }
  0xb1   : > { %v587_v45 = vmax.f32 %v541_v36, 1.0  ;;  %v589_v49 = vmax.f32 %v547_v38, 1.0  ;;  %v852_v36 = vld [vmem:[%s4157_s5 + $0x48] sm:$0xff] }
  0xb3   : > { %3095 = vrsqrt.f32 %v589_v49 }
  0xb4   : > { %728 = vadd.xlane.f32.xlu1 %v727_v46  ;;  %v544_v52 = vpop.xlane.xlu0 %543  ;;  %v550_v53 = vpop.xlane.xlu1 %549  ;;  %3097 = vrsqrt.f32 %v587_v45 }
  0xb5   : > { %v588_v54 = vmax.f32 %v544_v52, 1.0  ;;  %v590_v56 = vmax.f32 %v550_v53, 1.0 }
  0xb6   : > { %1182 = vperm.xlu0 %3046, %v843_v51   ;;  %v854_v51 = vld [vmem:[%s4157_s5 + $0x58] sm:$0xff] }
  0xb7   : > { %3099 = vrsqrt.f32 %v588_v54  ;;  %v845_v54 = vld [vmem:[%s4157_s5 + $0x10] sm:$0xff] }
  0xb8   : > { %737 = vadd.xlane.f32.xlu1 %v736_v55  ;;  %3101 = vrsqrt.f32 %v590_v56  ;;  %v556_v60 = vpop.xlane.xlu1 %555  ;;  %v553_v61 = vpop.xlane.xlu0 %552  ;;  %v856_v56 = vld [vmem:[%s4157_s5 + $0x68] sm:$0xff] }
  0xb9   : > { %v592_v62 = vmax.f32 %v556_v60, 1.0  ;;  %v591_v63 = vmax.f32 %v553_v61, 1.0 }
  0xba   : > { %1197 = vperm.xlu0 %3046, %v846_v59  }
  0xbb   : > { %3103 = vrsqrt.f32 %v592_v62 }
  0xbc   : > { %3105 = vrsqrt.f32 %v591_v63  ;;  %v562_v1 = vpop.xlane.xlu1 %561  ;;  %v559_v2 = vpop.xlane.xlu0 %558 }
  0xbd   : > { %v3096_v3 = vpop.eup %3095  ;;  %v594_v9 = vmax.f32 %v562_v1, 1.0  ;;  %v593_v11 = vmax.f32 %v559_v2, 1.0  ;;  %v858_v1 = vld [vmem:[%s4157_s5 + $0x78] sm:$0xff] }
  0xbe   : > { %1207 = vperm.xlu0 %3046, %v848_v0   ;;  %v3098_v10 = vpop.eup %3097  ;;  %v621_v19 = vmul.f32 %v3096_v3, %v3366_v4 }
  0xbf   : > { %v619_v28 = vmul.f32 %v3098_v10, %v3368_v5  ;;  %3107 = vrsqrt.f32 %v594_v9  ;;  %v849_v9 = vld [vmem:[%s4157_s5 + $0x30] sm:$0xff] }
  0xc0   : > { %3109 = vrsqrt.f32 %v593_v11  ;;  %v568_v33 = vpop.xlane.xlu1 %567  ;;  %v565_v45 = vpop.xlane.xlu0 %564  ;;  %v1641_v11 = vld [vmem:[%s4161_s9 + $0x8] sm:$0xff] }
  0xc1   : > { %v3100_v13 = vpop.eup %3099  ;;  %v595_v50 = vmax.f32 %v565_v45, 1.0  ;;  %v853_v45 = vld [vmem:[%s4157_s5 + $0x50] sm:$0xff] }
  0xc2   : > { %v3102_v20 = vpop.eup %3101  ;;  %v620_v29 = vmul.f32 %v3100_v13, %v3372_v7  ;;  %1217 = vperm.xlu0 %3046, %v850_v12   ;;  %v844_v7 = vld [vmem:[%s4157_s5 + $0x8] sm:$0xff] }
  0xc3   : > { %v622_v30 = vmul.f32 %v3102_v20, %v3370_v6  ;;  %v596_v6 = vmax.f32 %v568_v33, 1.0  ;;  %v1643_v33 = vld [vmem:[%s4161_s9 + $0x18] sm:$0xff] }
  0xc4   : > { %v635_v38 = vpack.c.bf16 %v620_v29, %v619_v28  ;;  %v574_v55 = vpop.xlane.xlu1 %573  ;;  %v571_v61 = vpop.xlane.xlu0 %570 }
  0xc5   : > { %v3104_v46 = vpop.eup %3103  ;;  %v636_v49 = vpack.c.bf16 %v622_v30, %v621_v19  ;;  %3111 = vrsqrt.f32 %v596_v6  ;;  %v598_v63 = vmax.f32 %v574_v55, 1.0  ;;  %v597_v0 = vmax.f32 %v571_v61, 1.0 }
  0xc6   : > { %v3106_v4 = vpop.eup %3105  ;;  %2989 = vmatprep.subr.msk.bf16.mxu0 %vm538_vm0, %v635_v38  ;;  %v1036_v5 = vsel %vm538_vm0, %v635_v38, 0  ;;  %1227 = vperm.xlu0 %3046, %v852_v36   ;;  %v624_v53 = vmul.f32 %v3104_v46, %v3374_v8  ;;  %3113 = vrsqrt.f32 %v595_v50 }
  0xc7   : > { %2798 = vmatpush3.bf16.xpose.msra.mxu0 %v1036_v5  ;;  %v623_v52 = vmul.f32 %v3106_v4, %v3394_v21  ;;  %v1039_v8 = vsel %vm538_vm0, %v636_v49, 0  ;;  %v847_v21 = vld [vmem:[%s4157_s5 + $0x20] sm:$0xff]  ;;  %3115 = vrsqrt.f32 %v598_v63 }
  0xc8   : > { %2990 = vmatprep.subr.msk.bf16.mxu0 %vm538_vm0, %v636_v49  ;;  %3117 = vrsqrt.f32 %v597_v0  ;;  %v580_v10 = vpop.xlane.xlu1 %579  ;;  %v1645_v49 = vld [vmem:[%s4161_s9 + $0x28] sm:$0xff] }
  0xc9   : > { %1187 = vperm.xlu1 %3045, %v844_v7   ;;  %v3108_v59 = vpop.eup %3107  ;;  %v637_v60 = vpack.c.bf16 %v624_v53, %v623_v52  ;;  %v600_v28 = vmax.f32 %v580_v10, 1.0  ;;  %v1647_v52 = vld [vmem:[%s4161_s9 + $0x38] sm:$0xff]  ;;  %v1653_v10 = vld [vmem:[%s4161_s9 + $0x68] sm:$0xff] }
  0xca   : > { %1237 = vperm.xlu0 %3046, %v854_v51   ;;  %v3110_v62 = vpop.eup %3109  ;;  %v626_v3 = vmul.f32 %v3108_v59, %v3389_v18  ;;  %v851_v18 = vld [vmem:[%s4157_s5 + $0x40] sm:$0xff]  ;;  %v1649_v59 = vld [vmem:[%s4161_s9 + $0x48] sm:$0xff] }
  0xcb   : > { %v625_v2 = vmul.f32 %v3110_v62, %v3396_v22  ;;  %v1042_v13 = vsel %vm538_vm0, %v637_v60, 0  ;;  %v577_v22 = vpop.xlane.xlu0 %576  ;;  %3119 = vrsqrt.f32 %v600_v28  ;;  %v1655_v28 = vld [vmem:[%s4161_s9 + $0x78] sm:$0xff] }
  0xcc   : > { %v599_v29 = vmax.f32 %v577_v22, 1.0  ;;  %v586_v30 = vpop.xlane.xlu1 %585  ;;  %v1644_v22 = vld [vmem:[%s4161_s9 + $0x20] sm:$0xff] }
  0xcd   : > { %1192 = vperm.xlu1 %3045, %v845_v54   ;;  %v638_v19 = vpack.c.bf16 %v626_v3, %v625_v2  ;;  %v602_v50 = vmax.f32 %v586_v30, 1.0 }
  0xce   : > { %1247 = vperm.xlu0 %3046, %v856_v56   ;;  %3121 = vrsqrt.f32 %v599_v29  ;;  %v857_v56 = vld [vmem:[%s4157_s5 + $0x70] sm:$0xff] }
  0xcf   : > { %2800 = vmatpush3.bf16.xpose.msra.mxu0 %v1039_v8  ;;  %v3112_v12 = vpop.eup %3111  ;;  %v1045_v5 = vsel %vm538_vm0, %v638_v19, 0  ;;  %3123 = vrsqrt.f32 %v602_v50 }
  0xd0   : > { %2991 = vmatprep.subr.msk.bf16.mxu0 %vm538_vm0, %v637_v60  ;;  %v3114_v20 = vpop.eup %3113  ;;  %v628_v38 = vmul.f32 %v3112_v12, %v3410_v26  ;;  %v696_v46 = vpop.xlane.xlu1 %695  ;;  %v855_v26 = vld [vmem:[%s4157_s5 + $0x60] sm:$0xff] }
  0xd1   : > { %1202 = vperm.xlu1 %3045, %v847_v21   ;;  %v627_v36 = vmul.f32 %v3114_v20, %v3412_v27  ;;  %v3116_v4 = vpop.eup %3115  ;;  %v583_v27 = vpop.xlane.xlu0 %582  ;;  %v740_v21 = vmax.f32 %v696_v46, 1.0 }
  0xd2   : > { %1257 = vperm.xlu0 %3046, %v858_v1   ;;  %v3118_v6 = vpop.eup %3117  ;;  %v601_v51 = vmax.f32 %v583_v27, 1.0  ;;  %v630_v54 = vmul.f32 %v3116_v4, %v3425_v37  ;;  %v1640_v37 = vld [vmem:[%s4161_s9] sm:$0xff]  ;;  %v1651_v1 = vld [vmem:[%s4161_s9 + $0x58] sm:$0xff] }
  0xd3   : > { %v639_v7 = vpack.c.bf16 %v628_v38, %v627_v36  ;;  %v629_v53 = vmul.f32 %v3118_v6, %v3434_v42  ;;  %v1673_v38 = vld [vmem:[%s4163_s11 + $0x8] sm:$0xff]  ;;  %v1675_v27 = vld [vmem:[%s4163_s11 + $0x18] sm:$0xff] }
  0xd4   : > { %v702_v55 = vpop.xlane.xlu1 %701  ;;  %3125 = vrsqrt.f32 %v601_v51  ;;  %v1650_v51 = vld [vmem:[%s4161_s9 + $0x50] sm:$0xff] }
  0xd5   : > { %1212 = vperm.xlu1 %3045, %v849_v9   ;;  %v3120_v60 = vpop.eup %3119  ;;  %v1048_v61 = vsel %vm538_vm0, %v639_v7, 0  ;;  %v640_v62 = vpack.c.bf16 %v630_v54, %v629_v53  ;;  %v693_v42 = vpop.xlane.xlu0 %692  ;;  %v1642_v9 = vld [vmem:[%s4161_s9 + $0x10] sm:$0xff]  ;;  %3127 = vrsqrt.f32 %v740_v21  ;;  %v742_v20 = vmax.f32 %v702_v55, 1.0  ;;  %v3048_v21 = vld [vmem:[%s4154_s2 + $0x8] sm:$0xff]  }
  0xd6   : > { %1727 = vperm.xlu0 %3046, %v1641_v11   ;;  %v739_v0 = vmax.f32 %v693_v42, 1.0  ;;  %v632_v3 = vmul.f32 %v3120_v60, %v3429_v39 }
  0xd7   : > { %2802 = vmatpush3.bf16.xpose.msra.mxu0 %v1042_v13  ;;  %v1051_v12 = vsel %vm538_vm0, %v640_v62, 0 }
  0xd8   : > { %2992 = vmatprep.subr.msk.bf16.mxu0 %vm538_vm0, %v638_v19  ;;  %v3122_v8 = vpop.eup %3121  ;;  %v708_v63 = vpop.xlane.xlu1 %707  ;;  %3129 = vrsqrt.f32 %v739_v0 }
  0xd9   : > { %1222 = vperm.xlu1 %3045, %v851_v18   ;;  %v631_v2 = vmul.f32 %v3122_v8, %v3442_v47  ;;  %v3124_v11 = vpop.eup %3123  ;;  %v699_v19 = vpop.xlane.xlu0 %698  ;;  %3131 = vrsqrt.f32 %v742_v20  ;;  %v744_v4 = vmax.f32 %v708_v63, 1.0  ;;  %v3049_v63 = vld [vmem:[%s4154_s2 + $0x10] sm:$0xff]   ;;  %v3051_v20 = vld [vmem:[%s4154_s2 + $0x20] sm:$0xff]  }
  0xda   : > { %1737 = vperm.xlu0 %3046, %v1643_v33   ;;  %v741_v18 = vmax.f32 %v699_v19, 1.0  ;;  %v634_v30 = vmul.f32 %v3124_v11, %v3431_v40  ;;  %v1646_v33 = vld [vmem:[%s4161_s9 + $0x30] sm:$0xff]  ;;  %v1648_v40 = vld [vmem:[%s4161_s9 + $0x40] sm:$0xff] }
  0xdb   : > { %v641_v13 = vpack.c.bf16 %v632_v3, %v631_v2 }
  0xdc   : > { %v711_v39 = vpop.xlane.xlu1 %710  ;;  %3133 = vrsqrt.f32 %v741_v18 }
  0xdd   : > { %1232 = vperm.xlu1 %3045, %v853_v45   ;;  %v1054_v46 = vsel %vm538_vm0, %v641_v13, 0  ;;  %3135 = vrsqrt.f32 %v744_v4  ;;  %v1678_v4 = vld [vmem:[%s4163_s11 + $0x30] sm:$0xff] }
  0xde   : > { %1747 = vperm.xlu0 %3046, %v1645_v49   ;;  %v3126_v47 = vpop.eup %3125 }
  0xdf   : > { %2804 = vmatpush3.bf16.xpose.msra.mxu0 %v1045_v5  ;;  %v633_v29 = vmul.f32 %v3126_v47, %v3444_v48  ;;  %v3128_v45 = vpop.eup %3127  ;;  %v705_v5 = vpop.xlane.xlu0 %704 }
  0xe0   : > { %2993 = vmatprep.subr.msk.bf16.mxu0 %vm538_vm0, %v639_v7  ;;  %v3711_v36 = vpop.xlane.xlu1 %716  ;;  %v743_v7 = vmax.f32 %v705_v5, 1.0  ;;  %v3052_v5 = vld [vmem:[%s4154_s2 + $0x28] sm:$0xff]  }
  0xe1   : > { %1242 = vperm.xlu1 %3045, %v855_v26   ;;  %v642_v48 = vpack.c.bf16 %v634_v30, %v633_v29  ;;  %v772_v26 = vmul.f32 %v3128_v45, %v3436_v43  ;;  %v1652_v43 = vld [vmem:[%s4161_s9 + $0x60] sm:$0xff] }
  0xe2   : > { %1757 = vperm.xlu0 %3046, %v1647_v52   ;;  %v3130_v49 = vpop.eup %3129  ;;  %3137 = vrsqrt.f32 %v743_v7  ;;  %v1677_v52 = vld [vmem:[%s4163_s11 + $0x28] sm:$0xff]  ;;  %v3053_v7 = vld [vmem:[%s4154_s2 + $0x30] sm:$0xff]  }
  0xe3   : > { %v771_v6 = vmul.f32 %v3130_v49, %v3462_v57  ;;  %v3132_v53 = vpop.eup %3131  ;;  %v1057_v54 = vsel %vm538_vm0, %v642_v48, 0 }
  0xe4   : > { %v3726_v50 = vpop.xlane.xlu1 %722  ;;  %v774_v8 = vmul.f32 %v3132_v53, %v3438_v44  ;;  %v1681_v44 = vld [vmem:[%s4163_s11 + $0x48] sm:$0xff] }
  0xe5   : > { %1252 = vperm.xlu1 %3045, %v857_v56   ;;  %v787_v57 = vpack.c.bf16 %v772_v26, %v771_v6  ;;  %v745_v56 = vmax.f32 %v711_v39, 1.0  ;;  %v1674_v39 = vld [vmem:[%s4163_s11 + $0x10] sm:$0xff] }
  0xe6   : > { %1767 = vperm.xlu0 %3046, %v1649_v59   ;;  %v3134_v55 = vpop.eup %3133  ;;  %v714_v59 = vpop.xlane.xlu0 %713 }
  0xe7   : > { %2806 = vmatpush3.bf16.xpose.msra.mxu0 %v1048_v61  ;;  %v746_v61 = vmax.f32 %v714_v59, 1.0  ;;  %v773_v42 = vmul.f32 %v3134_v55, %v3464_v58  ;;  %3139 = vrsqrt.f32 %v745_v56  ;;  %v3136_v58 = vpop.eup %3135  ;;  %v1865_v0 = vsel %vm538_vm0, %v787_v57, 0 }
  0xe8   : > { %2994 = vmatprep.subr.msk.bf16.mxu0 %vm538_vm0, %v640_v62  ;;  %v3738_v60 = vpop.permute.xlu1 %898  ;;  %v1679_v62 = vld [vmem:[%s4163_s11 + $0x38] sm:$0xff]  ;;  %v776_v47 = vmul.f32 %v3136_v58, %v3482_v14  ;;  %v1685_v14 = vld [vmem:[%s4163_s11 + $0x68] sm:$0xff] }
  0xe9   : > { %1722 = vperm.xlu1 %3045, %v1640_v37   ;;  %v1654_v37 = vld [vmem:[%s4161_s9 + $0x70] sm:$0xff]  ;;  %3141 = vrsqrt.f32 %v746_v61 }
  0xea   : > { %1777 = vperm.xlu0 %3046, %v1651_v1   ;;  %v788_v1 = vpack.c.bf16 %v774_v8, %v773_v42  ;;  %v720_v11 = vpop.xlane.xlu0 %719 }
  0xec   : > { %v3138_v2 = vpop.eup %3137  ;;  %v3759_v3 = vpop.permute.xlu1 %903 }
  0xed   : > { %1732 = vperm.xlu1 %3045, %v1642_v9   ;;  %v1672_v9 = vld [vmem:[%s4163_s11] sm:$0xff]  ;;  %v775_v19 = vmul.f32 %v3138_v2, %v3484_v15 }
  0xee   : > { %1787 = vperm.xlu0 %3046, %v1653_v10   ;;  %v747_v10 = vmax.f32 %v3711_v36, 1.0  ;;  %v749_v36 = vmax.f32 %v3726_v50, 1.0  ;;  %v1680_v50 = vld [vmem:[%s4163_s11 + $0x40] sm:$0xff] }
  0xef   : > { %2808 = vmatpush3.bf16.xpose.msra.mxu0 %v1051_v12  ;;  %v748_v12 = vmax.f32 %v720_v11, 1.0  ;;  %v789_v29 = vpack.c.bf16 %v776_v47, %v775_v19 }
  0xf0   : > { %2995 = vmatprep.subr.msk.bf16.mxu0 %vm538_vm0, %v641_v13  ;;  %v1683_v13 = vld [vmem:[%s4163_s11 + $0x58] sm:$0xff]  ;;  %3143 = vrsqrt.f32 %v747_v10  ;;  %v3782_v18 = vpop.permute.xlu1 %908 }
  0xf1   : > { %1742 = vperm.xlu1 %3045, %v1644_v22   ;;  %v3050_v22 = vld [vmem:[%s4154_s2 + $0x18] sm:$0xff]   ;;  %3145 = vrsqrt.f32 %v748_v12  ;;  %v3140_v15 = vpop.eup %3139 }
  0xf2   : > { %1797 = vperm.xlu0 %3046, %v1655_v28   ;;  %v1868_v28 = vsel %vm538_vm0, %v788_v1, 0  ;;  %3147 = vrsqrt.f32 %v749_v36 }
  0xf3   : > { %v3142_v30 = vpop.eup %3141 }
  0xf4   : > { %v778_v49 = vmul.f32 %v3142_v30, %v3493_v23 }
  0xf5   : > { %1752 = vperm.xlu1 %3045, %v1646_v33   ;;  %v1676_v33 = vld [vmem:[%s4163_s11 + $0x20] sm:$0xff] }
  0xf6   : > { %2016 = vperm.xlu0 %3046, %v1673_v38   ;;  %v726_v38 = vpop.xlane.xlu0 %725 }
  0xf7   : > { %2810 = vmatpush3.bf16.xpose.msra.mxu0 %v1054_v46  ;;  %v750_v45 = vmax.f32 %v726_v38, 1.0  ;;  %v1687_v46 = vld [vmem:[%s4163_s11 + $0x78] sm:$0xff] }
  0xf8   : > { %2996 = vmatprep.subr.msk.bf16.mxu0 %vm538_vm0, %v642_v48  ;;  %v777_v48 = vmul.f32 %v3140_v15, %v3487_v17  ;;  %v1704_v17 = vld [vmem:[%s4165_s13] sm:$0xff] }
  0xf9   : > { %1762 = vperm.xlu1 %3045, %v1648_v40   ;;  %v3800_v40 = vpop.permute.xlu1 %913  ;;  %3149 = vrsqrt.f32 %v750_v45 }
  0xfa   : > { %2026 = vperm.xlu0 %3046, %v1675_v27   ;;  %v3144_v23 = vpop.eup %3143  ;;  %v1871_v27 = vsel %vm538_vm0, %v789_v29, 0  ;;  %v790_v6 = vpack.c.bf16 %v778_v49, %v777_v48  ;;  %v3831_v55 = vpop.permute.xlu0 %893 }
  0xfb   : > { %v3146_v26 = vpop.eup %3145 }
  0xfc   : > { %v780_v53 = vmul.f32 %v3146_v26, %v3504_v32  ;;  %v3148_v56 = vpop.eup %3147 }
  0xfd   : > { %1772 = vperm.xlu1 %3045, %v1650_v51   ;;  %v3820_v51 = vpop.permute.xlu1 %923  ;;  %v781_v8 = vmul.f32 %v3148_v56, %v3507_v34 }
  0xfe   : > { %2036 = vperm.xlu0 %3046, %v1677_v52   ;;  %v779_v52 = vmul.f32 %v3144_v23, %v3497_v25  ;;  %v1874_v25 = vsel %vm538_vm0, %v790_v6, 0  ;;  %v3844_v42 = vpop.permute.xlu0 %918  ;;  %v3062_v23 = vld [vmem:[%s4160_s8 + $0x38] sm:$0xff]  }
  0xff   : > { %2812 = vmatpush3.bf16.xpose.msra.mxu0 %v1057_v54  ;;  %v1682_v54 = vld [vmem:[%s4163_s11 + $0x50] sm:$0xff] }
 0x100   : > { %2997 = vmatprep.subr.msk.bf16.mxu0 %vm538_vm0, %v787_v57  ;;  %v3054_v57 = vld [vmem:[%s4154_s2 + $0x38] sm:$0xff]   ;;  %v791_v59 = vpack.c.bf16 %v780_v53, %v779_v52 }
 0x101   : > { %1782 = vperm.xlu1 %3045, %v1652_v43   ;;  %v3055_v43 = vld [vmem:[%s4160_s8] sm:$0xff]   ;;  %v3837_v61 = vpop.permute.xlu1 %928 }
 0x102   : > { %2046 = vperm.xlu0 %3046, %v1679_v62   ;;  %v1684_v62 = vld [vmem:[%s4163_s11 + $0x60] sm:$0xff] }
 0x103   : > { %v3150_v32 = vpop.eup %3149 }
 0x105   : > { %1792 = vperm.xlu1 %3045, %v1654_v37   ;;  %v782_v37 = vmul.f32 %v3150_v32, %v3514_v41 }
 0x106   : > { %2814 = vmatmul.mubr.msk.bf16.vlgmr.msra.gmra.mrb[0].mxu0 %vm538_vm0, %v3048_v21  ;;  %2056 = vperm.xlu0 %3046, %v1681_v44   ;;  %v1686_v21 = vld [vmem:[%s4163_s11 + $0x70] sm:$0xff]  ;;  %v1877_v44 = vsel %vm538_vm0, %v791_v59, 0 }
 0x107   : > { %2817 = vmatprep.mubr.msk.bf16.mxu0 %vm538_vm0, %v3049_v63  ;;  %2894 = vmatpush3.bf16.xpose.msra.mxu0 %v1865_v0  ;;  %v3852_v63 = vpop.permute.xlu1 %933  ;;  %v792_v58 = vpack.c.bf16 %v782_v37, %v781_v8  ;;  %v875_v0 = vld [vmem:[%s4159_s7] sm:$0xff] }
 0x108   : > { %2998 = vmatprep.subr.msk.bf16.mxu0 %vm538_vm0, %v788_v1  ;;  %v3858_v1 = vpop.permute.xlu0 %938 }
 0x109   : > { %2011 = vperm.xlu1 %3045, %v1672_v9   ;;  %v1880_v2 = vsel %vm538_vm0, %v792_v58, 0 }
 0x10a   : > { %2066 = vperm.xlu0 %3046, %v1683_v13  }
 0x10b   : > { %v3861_v34 = vpop.permute.xlu1 %943 }
 0x10c   : > { %v3863_v41 = vpop.permute.xlu0 %953 }
 0x10d   : > { %2021 = vperm.xlu1 %3045, %v1674_v39  }
 0x10e   : > { %2818 = vmatmul.mubr.msk.bf16.gmra.mrb[4].mxu0 %vm538_vm0, %v3050_v22  ;;  %2076 = vperm.xlu0 %3046, %v1685_v14  }
 0x10f   : > { %2821 = vmatprep.mubr.msk.bf16.mxu0 %vm538_vm0, %v3051_v20  ;;  %2896 = vmatpush3.bf16.xpose.msra.mxu0 %v1868_v28  ;;  %v3866_v9 = vpop.permute.xlu1 %948 }
 0x110   : > { %2999 = vmatprep.subr.msk.bf16.mxu0 %vm538_vm0, %v789_v29  ;;  %v3868_v10 = vpop.permute.xlu0 %968 }
 0x111   : > { %2031 = vperm.xlu1 %3045, %v1676_v33  }
 0x112   : > { %2086 = vperm.xlu0 %3046, %v1687_v46  }
 0x113   : > { %v3870_v11 = vpop.permute.xlu1 %958 }
 0x115   : > { %2041 = vperm.xlu1 %3045, %v1678_v4  }
 0x116   : > { %2822 = vmatmul.mubr.msk.bf16.gmra.mrb[8].mxu0 %vm538_vm0, %v3052_v5  ;;  %2260 = vperm.xlu0 %3046, %v1704_v17   ;;  %v3061_v17 = vld [vmem:[%s4160_s8 + $0x30] sm:$0xff]  }
 0x117   : > { %2825 = vmatprep.mubr.msk.bf16.mxu0 %vm538_vm0, %v3053_v7  ;;  %2898 = vmatpush3.bf16.xpose.msra.mxu0 %v1871_v27  ;;  %v3872_v13 = vpop.permute.xlu1 %963  ;;  %v3060_v7 = vld [vmem:[%s4160_s8 + $0x28] sm:$0xff]   ;;  %v3063_v27 = vld [vmem:[%s4156_s4] sm:$0xff]  }
 0x118   : > { %3000 = vmatprep.subr.msk.bf16.mxu0 %vm538_vm0, %v790_v6  ;;  %2845 = vmatprep.mubr.bf16.mxu1 %v3063_v27 }
 0x119   : > { %2051 = vperm.xlu1 %3045, %v1680_v50  }
 0x11d   : > { %2061 = vperm.xlu1 %3045, %v1682_v54  }
 0x11e   : > { %2826 = vmatmul.mubr.msk.bf16.gmra.mrb[12].mxu0 %vm538_vm0, %v3054_v57 }
 0x11f   : > { %2900 = vmatpush3.bf16.xpose.msra.mxu0 %v1874_v25  ;;  %2909 = vmatprep.mubr.msk.bf16.mxu0 %vm538_vm0, %v3055_v43 }
 0x120   : > { %3001 = vmatprep.subr.msk.bf16.mxu0 %vm538_vm0, %v791_v59 }
 0x121   : > { %2071 = vperm.xlu1 %3045, %v1684_v62  }
 0x125   : > { %2081 = vperm.xlu1 %3045, %v1686_v21  }
 0x127   : > { %2902 = vmatpush3.bf16.xpose.msra.mxu0 %v1877_v44 }
 0x128   : > { %3002 = vmatprep.subr.msk.bf16.mxu0 %vm538_vm0, %v792_v58 }
 0x129   : > { %1431 = vperm.xlu1 %3045, %v875_v0   ;;  %v732_v12 = vpop.xlane.xlu0 %731 }
 0x12a   : > { %v752_v19 = vmax.f32 %v732_v12, 1.0 }
 0x12c   : > { %3151 = vrsqrt.f32 %v752_v19 }
 0x12d   : > { %v735_v47 = vpop.xlane.xlu0 %734 }
 0x12e   : > { %v753_v39 = vmax.f32 %v735_v47, 1.0 }
 0x12f   : > { %2904 = vmatpush3.bf16.xpose.msra.mxu0 %v1880_v2 }
 0x130   : > { %3153 = vrsqrt.f32 %v753_v39 }
 0x136   : > { %v3152_v28 = vpop.eup %3151 }
 0x137   : > { %v784_v30 = vmul.f32 %v3152_v28, %v3577_v16  ;;  %v3056_v16 = vld [vmem:[%s4160_s8 + $0x8] sm:$0xff]  }
 0x13a   : > { %v3154_v29 = vpop.eup %3153 }
 0x13b   : > { %v785_v45 = vmul.f32 %v3154_v29, %v3582_v24  ;;  %v3057_v24 = vld [vmem:[%s4160_s8 + $0x10] sm:$0xff]  }
 0x141   : > { %v729_v22 = vpop.xlane.xlu1 %728 }
 0x142   : > { %v751_v20 = vmax.f32 %v729_v22, 1.0 }
 0x144   : > { %3155 = vrsqrt.f32 %v751_v20 }
 0x145   : > { %v738_v14 = vpop.xlane.xlu1 %737 }
 0x146   : > { %v754_v15 = vmax.f32 %v738_v14, 1.0 }
 0x148   : > { %3157 = vrsqrt.f32 %v754_v15 }
 0x14e   : > { %v3156_v33 = vpop.eup %3155 }
 0x14f   : > { %v783_v36 = vmul.f32 %v3156_v33, %v3588_v31  ;;  %v3058_v31 = vld [vmem:[%s4160_s8 + $0x18] sm:$0xff]  }
 0x151   : > { %v793_v38 = vpack.c.bf16 %v784_v30, %v783_v36 }
 0x152   : > { %v3158_v46 = vpop.eup %3157 }
 0x153   : > { %3003 = vmatprep.subr.msk.bf16.mxu0 %vm538_vm0, %v793_v38  ;;  %v1883_v48 = vsel %vm538_vm0, %v793_v38, 0  ;;  %v786_v49 = vmul.f32 %v3158_v46, %v3592_v35  ;;  %v3059_v35 = vld [vmem:[%s4160_s8 + $0x20] sm:$0xff]  }
 0x154   : > { %2906 = vmatpush3.bf16.xpose.msra.mxu0 %v1883_v48 }
 0x155   : > { %v794_v4 = vpack.c.bf16 %v786_v49, %v785_v45 }
 0x157   : > { %3004 = vmatprep.subr.msk.bf16.mxu0 %vm538_vm0, %v794_v4  ;;  %v1886_v5 = vsel %vm538_vm0, %v794_v4, 0 }
 0x15c   : > { %2908 = vmatpush3.bf16.xpose.msra.mxu0 %v1886_v5  ;;  %v3931_v5 = vpop.permute.xlu0 %1182 }
 0x163   : > { %2910 = vmatmul.mubr.msk.bf16.vlgmr.msra.gmra.mrb[16].mxu0 %vm538_vm0, %v3056_v16 }
 0x164   : > { %2913 = vmatprep.mubr.msk.bf16.mxu0 %vm538_vm0, %v3057_v24 }
 0x16b   : > { %2914 = vmatmul.mubr.msk.bf16.gmra.mrb[20].mxu0 %vm538_vm0, %v3058_v31 }
 0x16c   : > { %2917 = vmatprep.mubr.msk.bf16.mxu0 %vm538_vm0, %v3059_v35 }
 0x173   : > { %2918 = vmatmul.mubr.msk.bf16.gmra.mrb[24].mxu0 %vm538_vm0, %v3060_v7 }
 0x174   : > { %2921 = vmatprep.mubr.msk.bf16.mxu0 %vm538_vm0, %v3061_v17  ;;  %v3935_v17 = vpop.permute.xlu0 %1197 }
 0x178   : > { %v3945_v27 = vpop.permute.xlu0 %1207 }
 0x17b   : > { %2922 = vmatmul.mubr.msk.bf16.gmra.mrb[28].mxu0 %vm538_vm0, %v3062_v23  ;;  %v3065_v23 = vld [vmem:[%s4156_s4 + $0x10] sm:$0xff]  }
 0x1d9   : > { %v2815_v6 = vpop.f32.mrb[0].mxu0 }
 0x1da   : > { %v1102_v26 = vadd.f32 %v2815_v6, %v3759_v3  ;;  %v1093_v50 = vpop.f32.mrb[1].mxu0 }
 0x1db   : > { %v1094_v52 = vadd.f32 %v1093_v50, %v3831_v55  ;;  %v2816_v53 = vpop.f32.mrb[2].mxu0  ;;  %v3952_v50 = vpop.permute.xlu0 %1217 }
 0x1dc   : > { %v1105_v54 = vadd.f32 %v2816_v53, %v3782_v18  ;;  %v1096_v57 = vpop.f32.mrb[3].mxu0  ;;  %v1158_v56 = vmax.f32 %v1102_v26, 0.0  ;;  %v3066_v26 = vld [vmem:[%s4156_s4 + $0x18] sm:$0xff]  }
 0x1dd   : > { %v1097_v43 = vadd.f32 %v1096_v57, %v3738_v60  ;;  %v1156_v59 = vmax.f32 %v1094_v52, 0.0  ;;  %v3067_v52 = vld [vmem:[%s4156_s4 + $0x20] sm:$0xff]   ;;  %v3068_v57 = vld [vmem:[%s4156_s4 + $0x28] sm:$0xff]  }
 0x1de   : > { %v1159_v25 = vmax.f32 %v1105_v54, 0.0 }
 0x1df   : > { %v1157_v32 = vmax.f32 %v1097_v43, 0.0  ;;  %v3959_v54 = vpop.permute.xlu0 %1227  ;;  %v3069_v43 = vld [vmem:[%s4156_s4 + $0x30] sm:$0xff]  }
 0x1e0   : > { %v1173_v62 = vpack.c.bf16 %v1159_v25, %v1158_v56 }
 0x1e1   : > { %v2819_v8 = vpop.f32.mrb[4].mxu0  ;;  %v1172_v37 = vpack.c.bf16 %v1157_v32, %v1156_v59  ;;  %v3070_v59 = vld [vmem:[%s4156_s4 + $0x38] sm:$0xff]  }
 0x1e2   : > { %v1118_v21 = vadd.f32 %v2819_v8, %v3820_v51  ;;  %v1109_v44 = vpop.f32.mrb[5].mxu0 }
 0x1e3   : > { %v1110_v3 = vadd.f32 %v1109_v44, %v3800_v40  ;;  %v2820_v58 = vpop.f32.mrb[6].mxu0  ;;  %2829 = vmatprep.subr.bf16.mxu1 %v1172_v37  ;;  %v3969_v25 = vpop.permute.xlu0 %1237 }
 0x1e4   : > { %v1121_v55 = vadd.f32 %v2820_v58, %v3837_v61  ;;  %v1112_v18 = vpop.f32.mrb[7].mxu0  ;;  %2830 = vmatpush3.bf16.msra.mxu1 %v1172_v37  ;;  %v1162_v0 = vmax.f32 %v1118_v21, 0.0 }
 0x1e5   : > { %v1113_v60 = vadd.f32 %v1112_v18, %v3844_v42  ;;  %2831 = vmatprep.subr.bf16.mxu1 %v1173_v62  ;;  %v1160_v12 = vmax.f32 %v1110_v3, 0.0 }
 0x1e6   : > { %v1163_v2 = vmax.f32 %v1121_v55, 0.0 }
 0x1e7   : > { %v1161_v19 = vmax.f32 %v1113_v60, 0.0 }
 0x1e8   : > { %v1175_v47 = vpack.c.bf16 %v1163_v2, %v1162_v0  ;;  %2832 = vmatpush3.bf16.msra.mxu1 %v1173_v62  ;;  %v3976_v62 = vpop.permute.xlu0 %1247 }
 0x1e9   : > { %v1174_v39 = vpack.c.bf16 %v1161_v19, %v1160_v12  ;;  %v2823_v51 = vpop.f32.mrb[8].mxu0 }
 0x1ea   : > { %v1134_v22 = vadd.f32 %v2823_v51, %v3861_v34  ;;  %v1125_v40 = vpop.f32.mrb[9].mxu0 }
 0x1eb   : > { %v1126_v20 = vadd.f32 %v1125_v40, %v3852_v63  ;;  %v2824_v14 = vpop.f32.mrb[10].mxu0  ;;  %2833 = vmatprep.subr.bf16.mxu1 %v1174_v39 }
 0x1ec   : > { %v1137_v61 = vadd.f32 %v2824_v14, %v3866_v9  ;;  %v1128_v15 = vpop.f32.mrb[11].mxu0  ;;  %2834 = vmatpush3.bf16.msra.mxu1 %v1174_v39  ;;  %v1166_v28 = vmax.f32 %v1134_v22, 0.0  ;;  %v3927_v9 = vpop.permute.xlu1 %1187 }
 0x1ed   : > { %v1129_v42 = vadd.f32 %v1128_v15, %v3858_v1  ;;  %2835 = vmatprep.subr.bf16.mxu1 %v1175_v47  ;;  %v1164_v30 = vmax.f32 %v1126_v20, 0.0  ;;  %v3980_v37 = vpop.permute.xlu0 %1257 }
 0x1ee   : > { %v1167_v29 = vmax.f32 %v1137_v61, 0.0 }
 0x1ef   : > { %v1165_v33 = vmax.f32 %v1129_v42, 0.0 }
 0x1f0   : > { %v1177_v36 = vpack.c.bf16 %v1167_v29, %v1166_v28  ;;  %2836 = vmatpush3.bf16.msra.mxu1 %v1175_v47  ;;  %v3933_v7 = vpop.permute.xlu1 %1192 }
 0x1f1   : > { %v1176_v38 = vpack.c.bf16 %v1165_v33, %v1164_v30  ;;  %v2827_v34 = vpop.f32.mrb[12].mxu0  ;;  %v1728_v44 = vpop.permute.xlu0 %1727 }
 0x1f2   : > { %v1150_v45 = vadd.f32 %v2827_v34, %v3872_v13  ;;  %v1141_v63 = vpop.f32.mrb[13].mxu0 }
 0x1f3   : > { %v1142_v46 = vadd.f32 %v1141_v63, %v3863_v41  ;;  %v2828_v48 = vpop.f32.mrb[14].mxu0  ;;  %2837 = vmatprep.subr.bf16.mxu1 %v1176_v38 }
 0x1f4   : > { %v1153_v1 = vadd.f32 %v2828_v48, %v3868_v10  ;;  %v1144_v49 = vpop.f32.mrb[15].mxu0  ;;  %2838 = vmatpush3.bf16.msra.mxu1 %v1176_v38  ;;  %v1170_v16 = vmax.f32 %v1150_v45, 0.0  ;;  %v3064_v10 = vld [vmem:[%s4156_s4 + $0x8] sm:$0xff]  }
 0x1f5   : > { %v1145_v4 = vadd.f32 %v1144_v49, %v3870_v11  ;;  %2839 = vmatprep.subr.bf16.mxu1 %v1177_v36  ;;  %v1168_v31 = vmax.f32 %v1142_v46, 0.0  ;;  %v3940_v11 = vpop.permute.xlu1 %1202  ;;  %v1738_v58 = vpop.permute.xlu0 %1737 }
 0x1f6   : > { %v1171_v24 = vmax.f32 %v1153_v1, 0.0 }
 0x1f7   : > { %v1169_v13 = vmax.f32 %v1145_v4, 0.0 }
 0x1f8   : > { %v1179_v35 = vpack.c.bf16 %v1171_v24, %v1170_v16  ;;  %2840 = vmatpush3.bf16.msra.mxu1 %v1177_v36 }
 0x1f9   : > { %v1178_v41 = vpack.c.bf16 %v1169_v13, %v1168_v31  ;;  %v3947_v6 = vpop.permute.xlu1 %1212  ;;  %v1748_v18 = vpop.permute.xlu0 %1747 }
 0x1fb   : > { %2841 = vmatprep.subr.bf16.mxu1 %v1178_v41 }
 0x1fc   : > { %2842 = vmatpush3.bf16.msra.mxu1 %v1178_v41 }
 0x1fd   : > { %2843 = vmatprep.subr.bf16.mxu1 %v1179_v35  ;;  %v3957_v53 = vpop.permute.xlu1 %1222  ;;  %v1758_v19 = vpop.permute.xlu0 %1757 }
 0x200   : > { %2844 = vmatpush3.bf16.msra.mxu1 %v1179_v35 }
 0x201   : > { %v3967_v56 = vpop.permute.xlu1 %1232  ;;  %v1768_v29 = vpop.permute.xlu0 %1767 }
 0x203   : > { %2846 = vmatmul.mubr.bf16.vlgmr.msra.gmra.mrb[0].mxu1 %v3064_v10 }
 0x204   : > { %2849 = vmatprep.mubr.bf16.mxu1 %v3065_v23 }
 0x205   : > { %v3974_v32 = vpop.permute.xlu1 %1242  ;;  %v1778_v16 = vpop.permute.xlu0 %1777 }
 0x209   : > { %v3978_v8 = vpop.permute.xlu1 %1252 }
 0x20b   : > { %2850 = vmatmul.mubr.bf16.gmra.mrb[4].mxu1 %v3066_v26 }
 0x20c   : > { %2853 = vmatprep.mubr.bf16.mxu1 %v3067_v52 }
 0x20d   : > { %v1723_v21 = vpop.permute.xlu1 %1722 }
 0x211   : > { %v1733_v3 = vpop.permute.xlu1 %1732 }
 0x213   : > { %2854 = vmatmul.mubr.bf16.gmra.mrb[8].mxu1 %v3068_v57 }
 0x214   : > { %2857 = vmatprep.mubr.bf16.mxu1 %v3069_v43 }
 0x215   : > { %v1743_v55 = vpop.permute.xlu1 %1742 }
 0x219   : > { %v1753_v60 = vpop.permute.xlu1 %1752 }
 0x21b   : > { %2858 = vmatmul.mubr.bf16.gmra.mrb[12].mxu1 %v3070_v59 }
 0x21d   : > { %v1763_v61 = vpop.permute.xlu1 %1762 }
 0x221   : > { %v1773_v48 = vpop.permute.xlu1 %1772 }
 0x225   : > { %v1783_v26 = vpop.permute.xlu1 %1782 }
 0x236   : > { %v2911_v0 = vpop.f32.mrb[16].mxu0 }
 0x237   : > { %v1931_v2 = vadd.f32 %v2911_v0, %v1733_v3  ;;  %v1922_v12 = vpop.f32.mrb[17].mxu0  ;;  %v1793_v0 = vpop.permute.xlu1 %1792 }
 0x238   : > { %v1923_v47 = vadd.f32 %v1922_v12, %v1723_v21  ;;  %v2912_v39 = vpop.f32.mrb[18].mxu0  ;;  %v1788_v21 = vpop.permute.xlu0 %1787 }
 0x239   : > { %v1934_v51 = vadd.f32 %v2912_v39, %v1738_v58  ;;  %v1925_v22 = vpop.f32.mrb[19].mxu0  ;;  %v1987_v20 = vmax.f32 %v1931_v2, 0.0 }
 0x23a   : > { %v1926_v40 = vadd.f32 %v1925_v22, %v1728_v44  ;;  %v1985_v15 = vmax.f32 %v1923_v47, 0.0 }
 0x23b   : > { %v1988_v14 = vmax.f32 %v1934_v51, 0.0 }
 0x23c   : > { %v1986_v42 = vmax.f32 %v1926_v40, 0.0  ;;  %v1798_v39 = vpop.permute.xlu0 %1797 }
 0x23d   : > { %v3982_v28 = vpack.c.bf16 %v1988_v14, %v1987_v20 }
 0x23e   : > { %v3984_v30 = vpack.c.bf16 %v1986_v42, %v1985_v15  ;;  %v2915_v33 = vpop.f32.mrb[20].mxu0 }
 0x23f   : > { %v1947_v36 = vadd.f32 %v2915_v33, %v1753_v60  ;;  %v1938_v38 = vpop.f32.mrb[21].mxu0 }
 0x240   : > { %v1939_v34 = vadd.f32 %v1938_v38, %v1743_v55  ;;  %v2916_v45 = vpop.f32.mrb[22].mxu0  ;;  %v3071_v38 = vld [vmem:[%s4158_s6] sm:$0xff]  }
 0x241   : > { %v1950_v63 = vadd.f32 %v2916_v45, %v1758_v19  ;;  %v1941_v46 = vpop.f32.mrb[23].mxu0  ;;  %v1991_v49 = vmax.f32 %v1947_v36, 0.0  ;;  %2877 = vmatprep.mubr.bf16.mxu1 %v3071_v38 }
 0x242   : > { %v1942_v1 = vadd.f32 %v1941_v46, %v1748_v18  ;;  %v1989_v24 = vmax.f32 %v1939_v34, 0.0 }
 0x243   : > { %v1992_v4 = vmax.f32 %v1950_v63, 0.0 }
 0x244   : > { %v1990_v31 = vmax.f32 %v1942_v1, 0.0 }
 0x245   : > { %v3986_v13 = vpack.c.bf16 %v1992_v4, %v1991_v49 }
 0x246   : > { %v3988_v35 = vpack.c.bf16 %v1990_v31, %v1989_v24  ;;  %v2919_v41 = vpop.f32.mrb[24].mxu0 }
 0x247   : > { %v1963_v10 = vadd.f32 %v2919_v41, %v1773_v48  ;;  %v1954_v23 = vpop.f32.mrb[25].mxu0 }
 0x248   : > { %v1955_v52 = vadd.f32 %v1954_v23, %v1763_v61  ;;  %v2920_v57 = vpop.f32.mrb[26].mxu0 }
 0x249   : > { %v1966_v43 = vadd.f32 %v2920_v57, %v1778_v16  ;;  %v1957_v59 = vpop.f32.mrb[27].mxu0  ;;  %v1995_v3 = vmax.f32 %v1963_v10, 0.0 }
 0x24a   : > { %v1958_v44 = vadd.f32 %v1957_v59, %v1768_v29  ;;  %v1993_v55 = vmax.f32 %v1955_v52, 0.0 }
 0x24b   : > { %v1996_v58 = vmax.f32 %v1966_v43, 0.0 }
 0x24c   : > { %v1994_v18 = vmax.f32 %v1958_v44, 0.0 }
 0x24d   : > { %v3990_v60 = vpack.c.bf16 %v1996_v58, %v1995_v3 }
 0x24e   : > { %v3992_v2 = vpack.c.bf16 %v1994_v18, %v1993_v55  ;;  %v2923_v12 = vpop.f32.mrb[28].mxu0 }
 0x24f   : > { %v1979_v19 = vadd.f32 %v2923_v12, %v1793_v0  ;;  %v1970_v47 = vpop.f32.mrb[29].mxu0 }
 0x250   : > { %v1971_v51 = vadd.f32 %v1970_v47, %v1783_v26  ;;  %v2924_v22 = vpop.f32.mrb[30].mxu0 }
 0x251   : > { %v1982_v40 = vadd.f32 %v2924_v22, %v1798_v39  ;;  %v1973_v20 = vpop.f32.mrb[31].mxu0  ;;  %v1999_v61 = vmax.f32 %v1979_v19, 0.0 }
 0x252   : > { %v1974_v14 = vadd.f32 %v1973_v20, %v1788_v21  ;;  %v1997_v42 = vmax.f32 %v1971_v51, 0.0 }
 0x253   : > { %v2000_v15 = vmax.f32 %v1982_v40, 0.0 }
 0x254   : > { %v1998_v29 = vmax.f32 %v1974_v14, 0.0 }
 0x255   : > { %v3994_v33 = vpack.c.bf16 %v2000_v15, %v1999_v61 }
 0x256   : > { %v3996_v36 = vpack.c.bf16 %v1998_v29, %v1997_v42 }
 0x2d6   : > { %v2847_v34 = vpop.f32.mrb[0].mxu1 }
 0x2d7   : > { %v1351_v45 = vadd.f32 %v2847_v34, %v3933_v7  ;;  %v1342_v63 = vpop.f32.mrb[1].mxu1 }
 0x2d8   : > { %v1343_v46 = vadd.f32 %v1342_v63, %v3931_v5  ;;  %v2848_v48 = vpop.f32.mrb[2].mxu1 }
 0x2d9   : > { %v1354_v1 = vadd.f32 %v2848_v48, %v3935_v17  ;;  %v1345_v49 = vpop.f32.mrb[3].mxu1  ;;  %v1407_v16 = vmax.f32 %v1351_v45, 0.0  ;;  %v3082_v48 = vld [vmem:[%s4162_s10 + $0x18] sm:$0xff]  }
 0x2da   : > { %v1346_v4 = vadd.f32 %v1345_v49, %v3927_v9  ;;  %v1405_v31 = vmax.f32 %v1343_v46, 0.0  ;;  %v3086_v49 = vld [vmem:[%s4162_s10 + $0x38] sm:$0xff]  }
 0x2db   : > { %v1408_v24 = vmax.f32 %v1354_v1, 0.0  ;;  %v3085_v1 = vld [vmem:[%s4162_s10 + $0x30] sm:$0xff]  }
 0x2dc   : > { %v1406_v41 = vmax.f32 %v1346_v4, 0.0  ;;  %v3087_v4 = vld [vmem:[%s4164_s12] sm:$0xff]  }
 0x2dd   : > { %v1422_v10 = vpack.c.bf16 %v1408_v24, %v1407_v16 }
 0x2de   : > { %v1421_v23 = vpack.c.bf16 %v1406_v41, %v1405_v31  ;;  %v2851_v26 = vpop.f32.mrb[4].mxu1 }
 0x2df   : > { %v1367_v52 = vadd.f32 %v2851_v26, %v3947_v6  ;;  %v1358_v57 = vpop.f32.mrb[5].mxu1 }
 0x2e0   : > { %v1359_v7 = vadd.f32 %v1358_v57, %v3940_v11  ;;  %v2852_v43 = vpop.f32.mrb[6].mxu1  ;;  %2861 = vmatprep.subr.bf16.mxu1 %v1421_v23  ;;  %v2012_v57 = vpop.permute.xlu1 %2011 }
 0x2e1   : > { %v1370_v5 = vadd.f32 %v2852_v43, %v3952_v50  ;;  %v1361_v17 = vpop.f32.mrb[7].mxu1  ;;  %2862 = vmatpush3.bf16.msra.mxu1 %v1421_v23  ;;  %v1411_v59 = vmax.f32 %v1367_v52, 0.0 }
 0x2e2   : > { %v1362_v9 = vadd.f32 %v1361_v17, %v3945_v27  ;;  %2863 = vmatprep.subr.bf16.mxu1 %v1422_v10  ;;  %v1409_v44 = vmax.f32 %v1359_v7, 0.0  ;;  %v2017_v7 = vpop.permute.xlu0 %2016 }
 0x2e3   : > { %v1412_v21 = vmax.f32 %v1370_v5, 0.0 }
 0x2e4   : > { %v1410_v3 = vmax.f32 %v1362_v9, 0.0 }
 0x2e5   : > { %v1424_v58 = vpack.c.bf16 %v1412_v21, %v1411_v59  ;;  %2864 = vmatpush3.bf16.msra.mxu1 %v1422_v10  ;;  %v2022_v59 = vpop.permute.xlu1 %2021 }
 0x2e6   : > { %v1423_v55 = vpack.c.bf16 %v1410_v3, %v1409_v44  ;;  %v2855_v6 = vpop.f32.mrb[8].mxu1  ;;  %v2027_v21 = vpop.permute.xlu0 %2026 }
 0x2e7   : > { %v1383_v18 = vadd.f32 %v2855_v6, %v3967_v56  ;;  %v1374_v11 = vpop.f32.mrb[9].mxu1 }
 0x2e8   : > { %v1375_v0 = vadd.f32 %v1374_v11, %v3957_v53  ;;  %v2856_v12 = vpop.f32.mrb[10].mxu1  ;;  %2865 = vmatprep.subr.bf16.mxu1 %v1423_v55 }
 0x2e9   : > { %v1386_v50 = vadd.f32 %v2856_v12, %v3969_v25  ;;  %v1377_v19 = vpop.f32.mrb[11].mxu1  ;;  %2866 = vmatpush3.bf16.msra.mxu1 %v1423_v55  ;;  %v1415_v47 = vmax.f32 %v1383_v18, 0.0 }
 0x2ea   : > { %v1378_v27 = vadd.f32 %v1377_v19, %v3959_v54  ;;  %2867 = vmatprep.subr.bf16.mxu1 %v1424_v58  ;;  %v1413_v51 = vmax.f32 %v1375_v0, 0.0  ;;  %v2037_v18 = vpop.permute.xlu0 %2036 }
 0x2eb   : > { %v1416_v39 = vmax.f32 %v1386_v50, 0.0 }
 0x2ec   : > { %v1414_v22 = vmax.f32 %v1378_v27, 0.0 }
 0x2ed   : > { %v1426_v40 = vpack.c.bf16 %v1416_v39, %v1415_v47  ;;  %2868 = vmatpush3.bf16.msra.mxu1 %v1424_v58  ;;  %v2032_v58 = vpop.permute.xlu1 %2031 }
 0x2ee   : > { %v1425_v20 = vpack.c.bf16 %v1414_v22, %v1413_v51  ;;  %v2859_v56 = vpop.f32.mrb[12].mxu1  ;;  %v2047_v19 = vpop.permute.xlu0 %2046 }
 0x2ef   : > { %v1399_v14 = vadd.f32 %v2859_v56, %v3978_v8  ;;  %v1390_v53 = vpop.f32.mrb[13].mxu1  ;;  %v3074_v8 = vld [vmem:[%s4158_s6 + $0x18] sm:$0xff]  }
 0x2f0   : > { %v1391_v61 = vadd.f32 %v1390_v53, %v3974_v32  ;;  %v2860_v15 = vpop.f32.mrb[14].mxu1  ;;  %2869 = vmatprep.subr.bf16.mxu1 %v1425_v20  ;;  %v3072_v32 = vld [vmem:[%s4158_s6 + $0x8] sm:$0xff]  }
 0x2f1   : > { %v1402_v25 = vadd.f32 %v2860_v15, %v3980_v37  ;;  %v1393_v42 = vpop.f32.mrb[15].mxu1  ;;  %2870 = vmatpush3.bf16.msra.mxu1 %v1425_v20  ;;  %v1419_v29 = vmax.f32 %v1399_v14, 0.0  ;;  %v3075_v37 = vld [vmem:[%s4158_s6 + $0x20] sm:$0xff]   ;;  %v2042_v11 = vpop.permute.xlu1 %2041 }
 0x2f2   : > { %v1394_v54 = vadd.f32 %v1393_v42, %v3976_v62  ;;  %2871 = vmatprep.subr.bf16.mxu1 %v1426_v40  ;;  %v1417_v34 = vmax.f32 %v1391_v61, 0.0  ;;  %v3073_v62 = vld [vmem:[%s4158_s6 + $0x10] sm:$0xff]   ;;  %v2057_v15 = vpop.permute.xlu0 %2056 }
 0x2f3   : > { %v1420_v38 = vmax.f32 %v1402_v25, 0.0 }
 0x2f4   : > { %v1418_v45 = vmax.f32 %v1394_v54, 0.0 }
 0x2f5   : > { %v1428_v63 = vpack.c.bf16 %v1420_v38, %v1419_v29  ;;  %2872 = vmatpush3.bf16.msra.mxu1 %v1426_v40  ;;  %v2052_v56 = vpop.permute.xlu1 %2051 }
 0x2f6   : > { %v1427_v46 = vpack.c.bf16 %v1418_v45, %v1417_v34 }
 0x2f8   : > { %2873 = vmatprep.subr.bf16.mxu1 %v1427_v46 }
 0x2f9   : > { %2874 = vmatpush3.bf16.msra.mxu1 %v1427_v46  ;;  %v2062_v46 = vpop.permute.xlu1 %2061 }
 0x2fa   : > { %2875 = vmatprep.subr.bf16.mxu1 %v1428_v63 }
 0x2fd   : > { %2876 = vmatpush3.bf16.msra.mxu1 %v1428_v63 }
 0x2fe   : > { %2925 = vmatprep.subr.bf16.mxu1 %v3984_v30 }
 0x300   : > { %2878 = vmatmul.mubr.bf16.vlgmr.msra.gmra.mrb[16].mxu1 %v3072_v32 }
 0x301   : > { %2926 = vmatpush3.bf16.msra.mxu1 %v3984_v30  ;;  %2881 = vmatprep.mubr.bf16.mxu1 %v3073_v62  ;;  %v3076_v30 = vld [vmem:[%s4158_s6 + $0x28] sm:$0xff]  }
 0x302   : > { %2927 = vmatprep.subr.bf16.mxu1 %v3982_v28 }
 0x305   : > { %2928 = vmatpush3.bf16.msra.mxu1 %v3982_v28  ;;  %v3077_v28 = vld [vmem:[%s4158_s6 + $0x30] sm:$0xff]  }
 0x306   : > { %2929 = vmatprep.subr.bf16.mxu1 %v3988_v35 }
 0x308   : > { %2882 = vmatmul.mubr.bf16.gmra.mrb[20].mxu1 %v3074_v8 }
 0x309   : > { %2930 = vmatpush3.bf16.msra.mxu1 %v3988_v35  ;;  %2885 = vmatprep.mubr.bf16.mxu1 %v3075_v37  ;;  %v3078_v35 = vld [vmem:[%s4158_s6 + $0x38] sm:$0xff]   ;;  %v2067_v37 = vpop.permute.xlu0 %2066 }
 0x30a   : > { %2931 = vmatprep.subr.bf16.mxu1 %v3986_v13 }
 0x30d   : > { %2932 = vmatpush3.bf16.msra.mxu1 %v3986_v13  ;;  %v3079_v13 = vld [vmem:[%s4162_s10] sm:$0xff]  }
 0x30e   : > { %2933 = vmatprep.subr.bf16.mxu1 %v3992_v2 }
 0x310   : > { %2886 = vmatmul.mubr.bf16.gmra.mrb[24].mxu1 %v3076_v30 }
 0x311   : > { %2934 = vmatpush3.bf16.msra.mxu1 %v3992_v2  ;;  %2889 = vmatprep.mubr.bf16.mxu1 %v3077_v28  ;;  %v3080_v2 = vld [vmem:[%s4162_s10 + $0x8] sm:$0xff]  }
 0x312   : > { %2935 = vmatprep.subr.bf16.mxu1 %v3990_v60 }
 0x315   : > { %2936 = vmatpush3.bf16.msra.mxu1 %v3990_v60  ;;  %v3081_v60 = vld [vmem:[%s4162_s10 + $0x10] sm:$0xff]  }
 0x316   : > { %2937 = vmatprep.subr.bf16.mxu1 %v3996_v36 }
 0x318   : > { %2890 = vmatmul.mubr.bf16.gmra.mrb[28].mxu1 %v3078_v35 }
 0x319   : > { %2938 = vmatpush3.bf16.msra.mxu1 %v3996_v36  ;;  %2941 = vmatprep.mubr.bf16.mxu1 %v3079_v13  ;;  %v3083_v36 = vld [vmem:[%s4162_s10 + $0x20] sm:$0xff]  }
 0x31a   : > { %2939 = vmatprep.subr.bf16.mxu1 %v3994_v33 }
 0x31d   : > { %2940 = vmatpush3.bf16.msra.mxu1 %v3994_v33  ;;  %v3084_v33 = vld [vmem:[%s4162_s10 + $0x28] sm:$0xff]  }
 0x320   : > { %2942 = vmatmul.mubr.bf16.vlgmr.msra.gmra.mrb[32].mxu1 %v3080_v2 }
 0x321   : > { %2945 = vmatprep.mubr.bf16.mxu1 %v3081_v60 }
 0x328   : > { %2946 = vmatmul.mubr.bf16.gmra.mrb[36].mxu1 %v3082_v48 }
 0x329   : > { %2949 = vmatprep.mubr.bf16.mxu1 %v3083_v36  ;;  %v2072_v36 = vpop.permute.xlu1 %2071 }
 0x330   : > { %2950 = vmatmul.mubr.bf16.gmra.mrb[40].mxu1 %v3084_v33 }
 0x331   : > { %2953 = vmatprep.mubr.bf16.mxu1 %v3085_v1 }
 0x338   : > { %2954 = vmatmul.mubr.bf16.gmra.mrb[44].mxu1 %v3086_v49 }
 0x339   : > { %2973 = vmatprep.mubr.bf16.mxu1 %v3087_v4 }
 0x3d3   : > { %v2879_v16 = vpop.f32.mrb[16].mxu1 }
 0x3d4   : > { %v4081_v24 = vpop.f32.mrb[17].mxu1  ;;  %v2077_v16 = vpop.permute.xlu0 %2076 }
 0x3d5   : > { %v2880_v31 = vpop.f32.mrb[18].mxu1 }
 0x3d6   : > { %v1579_v41 = vpop.f32.mrb[19].mxu1 }
 0x3db   : > { %v2883_v10 = vpop.f32.mrb[20].mxu1 }
 0x3dc   : > { %v1589_v23 = vpop.f32.mrb[21].mxu1 }
 0x3dd   : > { %v2884_v26 = vpop.f32.mrb[22].mxu1 }
 0x3de   : > { %v1591_v52 = vpop.f32.mrb[23].mxu1 }
 0x3e3   : > { %v2887_v43 = vpop.f32.mrb[24].mxu1 }
 0x3e4   : > { %v1601_v5 = vpop.f32.mrb[25].mxu1 }
 0x3e5   : > { %v2888_v17 = vpop.f32.mrb[26].mxu1 }
 0x3e6   : > { %v1603_v9 = vpop.f32.mrb[27].mxu1 }
 0x3e7   : > { %v2087_v9 = vpop.permute.xlu0 %2086 }
 0x3eb   : > { %v2891_v44 = vpop.f32.mrb[28].mxu1 }
 0x3ec   : > { %v1613_v3 = vpop.f32.mrb[29].mxu1 }
 0x3ed   : > { %v2892_v55 = vpop.f32.mrb[30].mxu1 }
 0x3ee   : > { %v1615_v6 = vpop.f32.mrb[31].mxu1 }
 0x3f3   : > { %v2943_v0 = vpop.f32.mrb[32].mxu1 }
 0x3f4   : > { %v2180_v12 = vadd.f32 %v2943_v0, %v2022_v59  ;;  %v2171_v50 = vpop.f32.mrb[33].mxu1 }
 0x3f5   : > { %v2172_v27 = vadd.f32 %v2171_v50, %v2012_v57  ;;  %v2944_v47 = vpop.f32.mrb[34].mxu1  ;;  %v2082_v57 = vpop.permute.xlu1 %2081  ;;  %v3088_v50 = vld [vmem:[%s4164_s12 + $0x8] sm:$0xff]  }
 0x3f6   : > { %v2183_v39 = vadd.f32 %v2944_v47, %v2027_v21  ;;  %v2174_v51 = vpop.f32.mrb[35].mxu1  ;;  %v2236_v40 = vmax.f32 %v2180_v12, 0.0  ;;  %v3091_v47 = vld [vmem:[%s4164_s12 + $0x20] sm:$0xff]  }
 0x3f7   : > { %v2175_v22 = vadd.f32 %v2174_v51, %v2017_v7  ;;  %v2234_v14 = vmax.f32 %v2172_v27, 0.0  ;;  %v3090_v27 = vld [vmem:[%s4164_s12 + $0x18] sm:$0xff]   ;;  %v3093_v51 = vld [vmem:[%s4164_s12 + $0x30] sm:$0xff]  }
 0x3f8   : > { %v2237_v20 = vmax.f32 %v2183_v39, 0.0  ;;  %v3092_v39 = vld [vmem:[%s4164_s12 + $0x28] sm:$0xff]  }
 0x3f9   : > { %v2235_v53 = vmax.f32 %v2175_v22, 0.0  ;;  %v3094_v22 = vld [vmem:[%s4164_s12 + $0x38] sm:$0xff]  }
 0x3fa   : > { %v2251_v61 = vpack.c.bf16 %v2237_v20, %v2236_v40  ;;  %v2261_v40 = vpop.permute.xlu0 %2260 }
 0x3fb   : > { %v2250_v25 = vpack.c.bf16 %v2235_v53, %v2234_v14  ;;  %v2947_v42 = vpop.f32.mrb[36].mxu1 }
 0x3fc   : > { %v2196_v54 = vadd.f32 %v2947_v42, %v2042_v11  ;;  %v2187_v29 = vpop.f32.mrb[37].mxu1 }
 0x3fd   : > { %v2188_v38 = vadd.f32 %v2187_v29, %v2032_v58  ;;  %v2948_v34 = vpop.f32.mrb[38].mxu1  ;;  %2957 = vmatprep.subr.bf16.mxu1 %v2250_v25 }
 0x3fe   : > { %v2199_v45 = vadd.f32 %v2948_v34, %v2047_v19  ;;  %v2190_v63 = vpop.f32.mrb[39].mxu1  ;;  %2958 = vmatpush3.bf16.msra.mxu1 %v2250_v25  ;;  %v2240_v62 = vmax.f32 %v2196_v54, 0.0  ;;  %v3089_v19 = vld [vmem:[%s4164_s12 + $0x10] sm:$0xff]  }
 0x3ff   : > { %v2191_v32 = vadd.f32 %v2190_v63, %v2037_v18  ;;  %2959 = vmatprep.subr.bf16.mxu1 %v2251_v61  ;;  %v2238_v30 = vmax.f32 %v2188_v38, 0.0 }
 0x400   : > { %v2241_v8 = vmax.f32 %v2199_v45, 0.0 }
 0x401   : > { %v2239_v28 = vmax.f32 %v2191_v32, 0.0 }
 0x402   : > { %v2253_v35 = vpack.c.bf16 %v2241_v8, %v2240_v62  ;;  %2960 = vmatpush3.bf16.msra.mxu1 %v2251_v61 }
 0x403   : > { %v2252_v13 = vpack.c.bf16 %v2239_v28, %v2238_v30  ;;  %v2951_v2 = vpop.f32.mrb[40].mxu1 }
 0x404   : > { %v2212_v60 = vadd.f32 %v2951_v2, %v2062_v46  ;;  %v2203_v48 = vpop.f32.mrb[41].mxu1 }
 0x405   : > { %v2204_v33 = vadd.f32 %v2203_v48, %v2052_v56  ;;  %v2952_v1 = vpop.f32.mrb[42].mxu1  ;;  %2961 = vmatprep.subr.bf16.mxu1 %v2252_v13  ;;  %v1432_v56 = vpop.permute.xlu1 %1431 }
 0x406   : > { %v2215_v49 = vadd.f32 %v2952_v1, %v2067_v37  ;;  %v2206_v4 = vpop.f32.mrb[43].mxu1  ;;  %2962 = vmatpush3.bf16.msra.mxu1 %v2252_v13  ;;  %v2244_v41 = vmax.f32 %v2212_v60, 0.0  ;;  %v1577_v53 = vadd.f32 %v4081_v24, %v1432_v56 }
 0x407   : > { %v2207_v31 = vadd.f32 %v2206_v4, %v2057_v15  ;;  %2963 = vmatprep.subr.bf16.mxu1 %v2253_v35  ;;  %v2242_v23 = vmax.f32 %v2204_v33, 0.0 }
 0x408   : > { %v2245_v10 = vmax.f32 %v2215_v49, 0.0 }
 0x409   : > { %v2243_v26 = vmax.f32 %v2207_v31, 0.0 }
 0x40a   : > { %v2255_v52 = vpack.c.bf16 %v2245_v10, %v2244_v41  ;;  %2964 = vmatpush3.bf16.msra.mxu1 %v2253_v35 }
 0x40b   : > { %v2254_v7 = vpack.c.bf16 %v2243_v26, %v2242_v23  ;;  %v2955_v43 = vpop.f32.mrb[44].mxu1 }
 0x40c   : > { %v2228_v5 = vadd.f32 %v2955_v43, %v2082_v57  ;;  %v2219_v17 = vpop.f32.mrb[45].mxu1 }
 0x40d   : > { %v2220_v59 = vadd.f32 %v2219_v17, %v2072_v36  ;;  %v2956_v21 = vpop.f32.mrb[46].mxu1  ;;  %2965 = vmatprep.subr.bf16.mxu1 %v2254_v7 }
 0x40e   : > { %v2231_v44 = vadd.f32 %v2956_v21, %v2087_v9  ;;  %v2222_v3 = vpop.f32.mrb[47].mxu1  ;;  %2966 = vmatpush3.bf16.msra.mxu1 %v2254_v7  ;;  %v2248_v55 = vmax.f32 %v2228_v5, 0.0 }
 0x40f   : > { %v2223_v58 = vadd.f32 %v2222_v3, %v2077_v16  ;;  %2967 = vmatprep.subr.bf16.mxu1 %v2255_v52  ;;  %v2246_v18 = vmax.f32 %v2220_v59, 0.0 }
 0x410   : > { %v2249_v6 = vmax.f32 %v2231_v44, 0.0 }
 0x411   : > { %v2247_v11 = vmax.f32 %v2223_v58, 0.0 }
 0x412   : > { %v2257_v0 = vpack.c.bf16 %v2249_v6, %v2248_v55  ;;  %2968 = vmatpush3.bf16.msra.mxu1 %v2255_v52 }
 0x413   : > { %v2256_v12 = vpack.c.bf16 %v2247_v11, %v2246_v18 }
 0x415   : > { %2969 = vmatprep.subr.bf16.mxu1 %v2256_v12 }
 0x416   : > { %2970 = vmatpush3.bf16.msra.mxu1 %v2256_v12 }
 0x417   : > { %2971 = vmatprep.subr.bf16.mxu1 %v2257_v0 }
 0x41a   : > { %2972 = vmatpush3.bf16.msra.mxu1 %v2257_v0 }
 0x41d   : > { %2974 = vmatmul.mubr.bf16.vlgmr.msra.gmra.mrb[48].mxu1 %v3088_v50 }
 0x41e   : > { %2977 = vmatprep.mubr.bf16.mxu1 %v3089_v19 }
 0x425   : > { %2978 = vmatmul.mubr.bf16.gmra.mrb[52].mxu1 %v3090_v27 }
 0x426   : > { %2981 = vmatprep.mubr.bf16.mxu1 %v3091_v47 }
 0x42d   : > { %2982 = vmatmul.mubr.bf16.gmra.mrb[56].mxu1 %v3092_v39 }
 0x42e   : > { %2985 = vmatprep.mubr.bf16.mxu1 %v3093_v51 }
 0x435   : > { %2986 = vmatmul.mubr.bf16.gmra.mrb[60].mxu1 %v3094_v22 }
 0x4f0   : > { %v2975_v20 = vpop.f32.mrb[48].mxu1 }
 0x4f1   : > { %v2405_v14 = vpop.f32.mrb[49].mxu1 }
 0x4f2   : > { %v2406_v61 = vadd.f32 %v2405_v14, %v2261_v40  ;;  %v2976_v15 = vpop.f32.mrb[50].mxu1 }
 0x4f3   : > { %v2408_v25 = vpop.f32.mrb[51].mxu1 }
 0x4f4   : > { %v2453_v42 = vmul.f32 %v2406_v61, %v1577_v53 }
 0x4f6   : > { %v2454_v54 = vrot.slane %v2453_v42, 4 }
 0x4f8   : > { %v2455_v29 = vadd.f32 %v2454_v54, %v2453_v42  ;;  %v2979_v38 = vpop.f32.mrb[52].mxu1 }
 0x4f9   : > { %v2418_v34 = vpop.f32.mrb[53].mxu1 }
 0x4fa   : > { %v2456_v45 = vrot.slane %v2455_v29, 2  ;;  %v2980_v63 = vpop.f32.mrb[54].mxu1 }
 0x4fb   : > { %v2420_v46 = vpop.f32.mrb[55].mxu1 }
 0x4fc   : > { %v2457_v32 = vadd.f32 %v2456_v45, %v2455_v29 }
 0x4fe   : > { %v2458_v62 = vrot.slane %v2457_v32, 1 }
 0x500   : > { %v2459_v8 = vadd.f32 %v2458_v62, %v2457_v32  ;;  %v2983_v37 = vpop.f32.mrb[56].mxu1 }
 0x501   : > { %v2430_v30 = vpop.f32.mrb[57].mxu1 }
 0x502   : > { %v2619_v28 = vmul.f32 -1.442695, %v2459_v8  ;;  %v2984_v24 = vpop.f32.mrb[58].mxu1 }
 0x503   : > { %v2432_v35 = vpop.f32.mrb[59].mxu1 }
 0x504   : > { %3159 = vpow2.f32 %v2619_v28 }
 0x508   : > { %v2987_v13 = vpop.f32.mrb[60].mxu1 }
 0x509   : > { %v2442_v2 = vpop.f32.mrb[61].mxu1 }
 0x50a   : > { %v2988_v60 = vpop.f32.mrb[62].mxu1 }
 0x50b   : > { %v2444_v48 = vpop.f32.mrb[63].mxu1 }
 0x50e   : > { %v3160_v36 = vpop.eup %3159 }
 0x50f   : > { %v2463_v33 = vadd.f32 1.0, %v3160_v36 }
 0x511   : > { %3161 = vrcp.f32 %v2463_v33 }
 0x51b   : > { %v3162_v1 = vpop.eup %3161 }
 0x51c   : > { %2466 = vst [vmem:[%s476_s27] sm:$0x1] %v3162_v1 }
 0x51d   : > { %3176 = shalt.err (!%p3173_p3)
}
 0x51e   : > { %s3177_s25 = scalar_lea.hbm %s4110_s17, 16  ;;  %s3181_s20 = scalar_lea.hbm %s4166_s14, 32 }
 0x51f   : > { %p3178_p4 = scmp.ne.s32.totalorder %s4110_s17, %s3177_s25  ;;  %p3182_p9 = scmp.lt.u32.totalorder %s4110_s17, %s4166_s14 }
 0x520   : > { %p3183_p10 = scmp.lt.u32.totalorder %s3181_s20, %s3177_s25  ;;  %p3185_p12 = scmp.lt.u32.totalorder %s3177_s25, %s4110_s17 }
 0x521   : > { %p3179_p7 = pnand %p3178_p4, %p3339_p5 }
 0x522   : > { %p3184_p11 = por %p3183_p10, %p3182_p9 }
 0x523   : > { %p3180_p8 = pneg %p3179_p7 }
 0x524   : > { %p3186_p13 = por %p3185_p12, %p3184_p11 }
 0x526   : > { %p3187_p0 = pnand %p3186_p13, %p3180_p8 }
 0x528   : > { %3190 = shalt.err (!%p3187_p0)
}
 0x529   : > { %3005 = dma.vmem_to_hbm [thread:$0]  (%p3339_p5), %s4112_s18, 16, %s4110_s17, %s2468_s21  }
 0x52a PF: > { %p3011_p1 = scmp.ge.s32.totalorder %s3225_s16, 2  ;;  %s2492_s0 = sand.u32 1, %s3213_s29  }
 0x52b   : > { %s2493_s15 = scalar_lea.sflag [#allocation3], %s2492_s0 }
 0x52c   : > { %p3008_p2 = pnand %p3011_p1, %p3343_p6 }
 0x52e   : > { %3208 = dma.done.wait (!%p3008_p2), %s2493_s15, 16  }
 0x52f   : > { %3210 = vsyncadd (!%p3008_p2), %s2493_s15, 4294967280  ;;  %s4176_s22 = sld [smem:[#allocation5_spill]]  ;;  %s4177_s15 = sld [smem:[#allocation6_spill]] }
 0x530   : > { %p24_p3 = scmp.ge.s32.totalorder %s3327_s19, 4   ;;  %s4178_s29 = smov %s3217_s30 }
 0x531   : > { %s4180_s16 = smov %s3327_s19 }
 0x532   :  { %26 = sbr.rel (!%p24_p3) target bundleno = 6 (0x6), region = 114 }
 0x535   : > { %s4179_s30 = smov %s4176_s22 }
 0x539   :  { %2497 = vsyncpa [#allocation3], 1 }
 0x53a   :  { %2499 = vsyncpa [#allocation3 + $0x1], 1 }

</bundles_post_ra>
